<compile_context>
chip_gen: v7x
topology: tpu7x:2x2x1
jax: 0.10.0
libtpu: 0.0.40
codegen_flags: <defaults>
</compile_context>

<pallas_src>
import jax
import jax.numpy as jnp
from jax.experimental import pallas as pl
from jax.experimental.pallas import tpu as pltpu

# True / lane-padded layer sizes.
_H1, _H2, _H3 = 400, 400, 300
_H1P, _H2P, _H3P = 512, 512, 384
_OUTP = 128          # output layer padded to a full lane group (col 0 = Q)
_SUB = 16            # batch-tile granularity (bf16 sublane pack)


def _round_up(n, m):
    return (n + m - 1) // m * m


def _cdiv(a, b):
    return -(-a // b)


def _default_batch_tile():
    """1024 rows on v6e/v7x; 512 on v5e (16 MiB scoped VMEM, slower MXU)."""
    try:
        kind = jax.devices()[0].device_kind.lower()
    except Exception:  # pragma: no cover - defensive; any failure -> generic
        kind = ""
    if ("v5 lite" in kind) or ("v5e" in kind) or ("v5litepod" in kind):
        return 512
    return 1024


def _choose_tiling(B, batch_tile, min_steps):
    """Pick (TB, Bp): batch tile and padded batch. TB is a multiple of 16."""
    batch_tile = max(_SUB, _round_up(batch_tile, _SUB))
    Bp = _round_up(B, _SUB)
    if Bp <= batch_tile and min_steps <= 1:
        return Bp, Bp
    steps = max(min_steps, _cdiv(Bp, batch_tile))
    if min_steps >= 2 and steps % 2:
        steps += 1  # even step count -> balanced split across v7x's 2 TCs
    TB = _round_up(_cdiv(Bp, steps), _SUB)
    Bp = _round_up(Bp, TB)
    return TB, Bp


def _vmem_limit_bytes(TB, kin_p, weight_bytes):
    """Explicit scoped-VMEM budget: double-buffered I/O blocks + in-kernel
    activations (+bf16 recasts) + weights (counted twice for safety)."""
    io = TB * kin_p * 2 * 2 + TB * _OUTP * 4 * 2
    acts = TB * (_H1P * 6 + _H2P * 6 + _H3P * 6 + _OUTP * 4)
    total = 2 * weight_bytes + io + acts
    return int(min(64 << 20, total * 3 // 2 + (4 << 20)))


def _valuenet_kernel(xa_ref, w1_ref, b1_ref, w2_ref, b2_ref,
                     w3_ref, b3_ref, w4_ref, b4_ref, out_ref):
    # Layer 1: single fused dot over the packed [x|a] input (zero-padded lanes
    # hit zero rows of w1).  bf16 operands, f32 accumulation, f32 bias+relu.
    h1 = jnp.dot(xa_ref[...], w1_ref[...], preferred_element_type=jnp.float32)
    h1 = jnp.maximum(h1 + b1_ref[...], 0.0)

    # Layer 2: (TB,512) @ (512,512)
    h2 = jnp.dot(h1.astype(jnp.bfloat16), w2_ref[...],
                 preferred_element_type=jnp.float32)
    h2 = jnp.maximum(h2 + b2_ref[...], 0.0)

    # Layer 3: (TB,512) @ (512,384)
    h3 = jnp.dot(h2.astype(jnp.bfloat16), w3_ref[...],
                 preferred_element_type=jnp.float32)
    h3 = jnp.maximum(h3 + b3_ref[...], 0.0)

    # Output layer on the MXU with N padded to 128: only column 0 carries real
    # weights, so column 0 is the Q value.  This keeps the store lane-dense
    # (unmasked vst on a (TB,128) f32 block) and avoids an XLU cross-lane
    # reduction on the serial critical path.
    q = jnp.dot(h3.astype(jnp.bfloat16), w4_ref[...],
                preferred_element_type=jnp.float32)
    out_ref[...] = (q + b4_ref[...]).astype(out_ref.dtype)


def value_net_forward(x, a, params, *, batch_tile=None):
    """x: (B, observations), a: (B, actions) -> (B, 1) float32."""
    if batch_tile is None:
        batch_tile = _default_batch_tile()

    B = x.shape[0]
    w1 = params["w1"]
    kin_p = w1.shape[0]  # lane-padded (obs + act), multiple of 128

    # >= 2 grid steps for moderate/large batches so the "parallel" batch axis
    # actually shards across v7x's two TensorCores (harmless on v5e/v6e).
    min_steps = 2 if B > 128 else 1
    TB, Bp = _choose_tiling(B, batch_tile, min_steps)

    # Fused concat: pack [x | a] into one lane-padded bf16 slab, pad batch rows.
    xa = jnp.concatenate([x, a], axis=-1).astype(jnp.bfloat16)
    xa = jnp.pad(xa, ((0, Bp - B), (0, kin_p - xa.shape[1])))

    operands = (xa,
                params["w1"], params["b1"],
                params["w2"], params["b2"],
                params["w3"], params["b3"],
                params["w4"], params["b4"])

    def resident_spec(arr):
        # Constant block index across the grid -> stays in VMEM; single buffer
        # (no point double-buffering a block that never changes).
        return pl.BlockSpec(arr.shape, lambda i: (0, 0),
                            pipeline_mode=pl.Buffered(1))

    in_specs = [pl.BlockSpec((TB, kin_p), lambda i: (i, 0))]
    in_specs += [resident_spec(op) for op in operands[1:]]
    out_spec = pl.BlockSpec((TB, _OUTP), lambda i: (i, 0))

    weight_bytes = sum(int(v.size) * v.dtype.itemsize
                       for k, v in params.items())
    flops = 2 * Bp * (kin_p * _H1P + _H1P * _H2P + _H2P * _H3P + _H3P * _OUTP)
    bytes_accessed = (Bp * kin_p * 2) + weight_bytes + (Bp * _OUTP * 4)

    out = pl.pallas_call(
        _valuenet_kernel,
        out_shape=jax.ShapeDtypeStruct((Bp, _OUTP), jnp.float32),
        grid=(Bp // TB,),
        in_specs=in_specs,
        out_specs=out_spec,
        compiler_params=pltpu.CompilerParams(
            dimension_semantics=("parallel",),
            vmem_limit_bytes=_vmem_limit_bytes(TB, kin_p, weight_bytes)),
        cost_estimate=pl.CostEstimate(
            flops=flops, transcendentals=0, bytes_accessed=bytes_accessed),
    )(*operands)

    return out[:B, :1]


def init_value_net_params(key, observations, actions):
    """nn.Linear-style init (U(+-1/sqrt(fan_in))), stored in the kernel layout:
    weights as (in, out) bf16, zero-padded to lane-dense sizes; biases f32.
    Layer 1 takes the packed [x|a] input padded to a multiple of 128 lanes;
    the output layer is padded to 128 columns (only column 0 is real)."""
    kin = observations + actions
    kin_p = max(128, _round_up(kin, 128))
    true_dims = [(kin, _H1), (_H1, _H2), (_H2, _H3), (_H3, 1)]
    pad_dims = [(kin_p, _H1P), (_H1P, _H2P), (_H2P, _H3P), (_H3P, _OUTP)]

    # Note: optional fp8 storage of w2/w3 (bf16 x fp8 MXU) is a v7x-only win;
    # kept bf16 here for cross-generation correctness.
    params = {}
    for i, ((fi, fo), (fip, fop)) in enumerate(zip(true_dims, pad_dims)):
        kw, kb = jax.random.split(jax.random.fold_in(key, i))
        bound = 1.0 / (fi ** 0.5)
        w = jax.random.uniform(kw, (fi, fo), jnp.float32, -bound, bound)
        b = jax.random.uniform(kb, (1, fo), jnp.float32, -bound, bound)
        w = jnp.pad(w, ((0, fip - fi), (0, fop - fo)))
        b = jnp.pad(b, ((0, 0), (0, fop - fo)))
        params[f"w{i + 1}"] = w.astype(jnp.bfloat16)
        params[f"b{i + 1}"] = b  # f32
    return params


def value_net_reference(x, a, params):
    """Pure-JAX reference mirroring the kernel's numerics (bf16 matmul inputs,
    f32 accumulation, zero-padded hidden/lane dims)."""
    kin_p = params["w1"].shape[0]
    xa = jnp.concatenate([x, a], axis=-1)
    xa = jnp.pad(xa, ((0, 0), (0, kin_p - xa.shape[1]))).astype(jnp.bfloat16)
    h = xa
    for i in ("1", "2", "3"):
        h = jnp.dot(h, params["w" + i], preferred_element_type=jnp.float32)
        h = jnp.maximum(h + params["b" + i], 0.0).astype(jnp.bfloat16)
    q = jnp.dot(h, params["w4"], preferred_element_type=jnp.float32)
    q = q + params["b4"]
    return q[:, :1]


if __name__ == "__main__":
    key = jax.random.PRNGKey(0)
    k_x, k_a, k_x2, k_a2, k_p = jax.random.split(key, 5)

    observations, actions = 16, 8
    params = init_value_net_params(k_p, observations, actions)

    # Small batch: single grid step.
    batch = 8
    x = jax.random.normal(k_x, (batch, observations), jnp.float32)
    a = jax.random.normal(k_a, (batch, actions), jnp.float32)
    out = jax.block_until_ready(value_net_forward(x, a, params))
    ref = value_net_reference(x, a, params)
    assert out.shape == (batch, 1), out.shape
    assert jnp.allclose(out, ref, atol=1e-2, rtol=1e-2), (out, ref)

    # Moderate batch: exercises the >=2-step "parallel" grid (v7x megacore).
    batch2 = 384
    x2 = jax.random.normal(k_x2, (batch2, observations), jnp.float32)
    a2 = jax.random.normal(k_a2, (batch2, actions), jnp.float32)
    out2 = jax.block_until_ready(value_net_forward(x2, a2, params))
    ref2 = value_net_reference(x2, a2, params)
    assert out2.shape == (batch2, 1), out2.shape
    assert jnp.allclose(out2, ref2, atol=1e-2, rtol=1e-2), (out2, ref2)

    print("KERNEL_OK")
</pallas_src>

<mosaic_0001>
module attributes {stable_mosaic.version = 11 : i64} {
  func.func @_valuenet_kernel(%arg0: i32, %arg1: memref<16x128xbf16, #tpu.memory_space<vmem>>, %arg2: memref<128x512xbf16, #tpu.memory_space<vmem>>, %arg3: memref<1x512xf32, #tpu.memory_space<vmem>>, %arg4: memref<512x512xbf16, #tpu.memory_space<vmem>>, %arg5: memref<1x512xf32, #tpu.memory_space<vmem>>, %arg6: memref<512x384xbf16, #tpu.memory_space<vmem>>, %arg7: memref<1x384xf32, #tpu.memory_space<vmem>>, %arg8: memref<384x128xbf16, #tpu.memory_space<vmem>>, %arg9: memref<1x128xf32, #tpu.memory_space<vmem>>, %arg10: memref<16x128xf32, #tpu.memory_space<vmem>>) attributes {dimension_semantics = [#tpu.dimension_semantics<parallel>], iteration_bounds = array<i64: 1>, scalar_prefetch = 0 : i64, scratch_operands = 0 : i64, tpu.core_type = #tpu.core_type<tc>, window_params = [{transform_indices = @transform_0, window_bounds = array<i64: 16, 128>}, {pipeline_mode = #tpu.pipeline_mode<synchronous>, transform_indices = @transform_1, window_bounds = array<i64: 128, 512>}, {pipeline_mode = #tpu.pipeline_mode<synchronous>, transform_indices = @transform_2, window_bounds = array<i64: 1, 512>}, {pipeline_mode = #tpu.pipeline_mode<synchronous>, transform_indices = @transform_3, window_bounds = array<i64: 512, 512>}, {pipeline_mode = #tpu.pipeline_mode<synchronous>, transform_indices = @transform_4, window_bounds = array<i64: 1, 512>}, {pipeline_mode = #tpu.pipeline_mode<synchronous>, transform_indices = @transform_5, window_bounds = array<i64: 512, 384>}, {pipeline_mode = #tpu.pipeline_mode<synchronous>, transform_indices = @transform_6, window_bounds = array<i64: 1, 384>}, {pipeline_mode = #tpu.pipeline_mode<synchronous>, transform_indices = @transform_7, window_bounds = array<i64: 384, 128>}, {pipeline_mode = #tpu.pipeline_mode<synchronous>, transform_indices = @transform_8, window_bounds = array<i64: 1, 128>}, {transform_indices = @transform_9, window_bounds = array<i64: 16, 128>}]} {
    %c0 = arith.constant 0 : index
    %c0_0 = arith.constant 0 : index
    %0 = vector.load %arg1[%c0, %c0_0] : memref<16x128xbf16, #tpu.memory_space<vmem>>, vector<16x128xbf16>
    %c0_1 = arith.constant 0 : index
    %c0_2 = arith.constant 0 : index
    %1 = vector.load %arg2[%c0_1, %c0_2] : memref<128x512xbf16, #tpu.memory_space<vmem>>, vector<128x512xbf16>
    %cst = arith.constant dense<0.000000e+00> : vector<16x512xf32>
    %2 = tpu.matmul %0, %1, %cst {dimension_numbers = #tpu.dot_dimension_numbers<[1], [0], [0], [1], [0, 0, 1, 1], [], []>} : vector<16x128xbf16>, vector<128x512xbf16>, vector<16x512xf32> -> vector<16x512xf32>
    %c0_3 = arith.constant 0 : index
    %c0_4 = arith.constant 0 : index
    %3 = vector.load %arg3[%c0_3, %c0_4] : memref<1x512xf32, #tpu.memory_space<vmem>>, vector<1x512xf32>
    %4 = vector.broadcast %3 : vector<1x512xf32> to vector<16x512xf32>
    %5 = arith.addf %2, %4 : vector<16x512xf32>
    %cst_5 = arith.constant 0.000000e+00 : f32
    %6 = vector.broadcast %cst_5 : f32 to vector<16x512xf32>
    %7 = arith.maximumf %5, %6 : vector<16x512xf32>
    %8 = arith.truncf %7 : vector<16x512xf32> to vector<16x512xbf16>
    %c0_6 = arith.constant 0 : index
    %c0_7 = arith.constant 0 : index
    %9 = vector.load %arg4[%c0_6, %c0_7] : memref<512x512xbf16, #tpu.memory_space<vmem>>, vector<512x512xbf16>
    %cst_8 = arith.constant dense<0.000000e+00> : vector<16x512xf32>
    %10 = tpu.matmul %8, %9, %cst_8 {dimension_numbers = #tpu.dot_dimension_numbers<[1], [0], [0], [1], [0, 0, 1, 1], [], []>} : vector<16x512xbf16>, vector<512x512xbf16>, vector<16x512xf32> -> vector<16x512xf32>
    %c0_9 = arith.constant 0 : index
    %c0_10 = arith.constant 0 : index
    %11 = vector.load %arg5[%c0_9, %c0_10] : memref<1x512xf32, #tpu.memory_space<vmem>>, vector<1x512xf32>
    %12 = vector.broadcast %11 : vector<1x512xf32> to vector<16x512xf32>
    %13 = arith.addf %10, %12 : vector<16x512xf32>
    %cst_11 = arith.constant 0.000000e+00 : f32
    %14 = vector.broadcast %cst_11 : f32 to vector<16x512xf32>
    %15 = arith.maximumf %13, %14 : vector<16x512xf32>
    %16 = arith.truncf %15 : vector<16x512xf32> to vector<16x512xbf16>
    %c0_12 = arith.constant 0 : index
    %c0_13 = arith.constant 0 : index
    %17 = vector.load %arg6[%c0_12, %c0_13] : memref<512x384xbf16, #tpu.memory_space<vmem>>, vector<512x384xbf16>
    %cst_14 = arith.constant dense<0.000000e+00> : vector<16x384xf32>
    %18 = tpu.matmul %16, %17, %cst_14 {dimension_numbers = #tpu.dot_dimension_numbers<[1], [0], [0], [1], [0, 0, 1, 1], [], []>} : vector<16x512xbf16>, vector<512x384xbf16>, vector<16x384xf32> -> vector<16x384xf32>
    %c0_15 = arith.constant 0 : index
    %c0_16 = arith.constant 0 : index
    %19 = vector.load %arg7[%c0_15, %c0_16] : memref<1x384xf32, #tpu.memory_space<vmem>>, vector<1x384xf32>
    %20 = vector.broadcast %19 : vector<1x384xf32> to vector<16x384xf32>
    %21 = arith.addf %18, %20 : vector<16x384xf32>
    %cst_17 = arith.constant 0.000000e+00 : f32
    %22 = vector.broadcast %cst_17 : f32 to vector<16x384xf32>
    %23 = arith.maximumf %21, %22 : vector<16x384xf32>
    %24 = arith.truncf %23 : vector<16x384xf32> to vector<16x384xbf16>
    %c0_18 = arith.constant 0 : index
    %c0_19 = arith.constant 0 : index
    %25 = vector.load %arg8[%c0_18, %c0_19] : memref<384x128xbf16, #tpu.memory_space<vmem>>, vector<384x128xbf16>
    %cst_20 = arith.constant dense<0.000000e+00> : vector<16x128xf32>
    %26 = tpu.matmul %24, %25, %cst_20 {dimension_numbers = #tpu.dot_dimension_numbers<[1], [0], [0], [1], [0, 0, 1, 1], [], []>} : vector<16x384xbf16>, vector<384x128xbf16>, vector<16x128xf32> -> vector<16x128xf32>
    %c0_21 = arith.constant 0 : index
    %c0_22 = arith.constant 0 : index
    %27 = vector.load %arg9[%c0_21, %c0_22] : memref<1x128xf32, #tpu.memory_space<vmem>>, vector<1x128xf32>
    %28 = vector.broadcast %27 : vector<1x128xf32> to vector<16x128xf32>
    %29 = arith.addf %26, %28 : vector<16x128xf32>
    %c0_23 = arith.constant 0 : index
    %c0_24 = arith.constant 0 : index
    %30 = vector.load %arg10[%c0_23, %c0_24] : memref<16x128xf32, #tpu.memory_space<vmem>>, vector<16x128xf32>
    tpu.vector_store %arg10[%c0_23, %c0_24], %29 {strides = array<i32>} : memref<16x128xf32, #tpu.memory_space<vmem>>, vector<16x128xf32>,
    return
  }
  func.func @transform_0(%arg0: i32) -> (i32, i32) {
    %c0_i32 = arith.constant 0 : i32
    %c0_i32_0 = arith.constant 0 : i32
    return %arg0, %c0_i32 : i32, i32
  }
  func.func @transform_1(%arg0: i32) -> (i32, i32) {
    %c0_i32 = arith.constant 0 : i32
    %c0_i32_0 = arith.constant 0 : i32
    %c0_i32_1 = arith.constant 0 : i32
    return %c0_i32, %c0_i32_0 : i32, i32
  }
  func.func @transform_2(%arg0: i32) -> (i32, i32) {
    %c0_i32 = arith.constant 0 : i32
    %c0_i32_0 = arith.constant 0 : i32
    %c0_i32_1 = arith.constant 0 : i32
    return %c0_i32, %c0_i32_0 : i32, i32
  }
  func.func @transform_3(%arg0: i32) -> (i32, i32) {
    %c0_i32 = arith.constant 0 : i32
    %c0_i32_0 = arith.constant 0 : i32
    %c0_i32_1 = arith.constant 0 : i32
    return %c0_i32, %c0_i32_0 : i32, i32
  }
  func.func @transform_4(%arg0: i32) -> (i32, i32) {
    %c0_i32 = arith.constant 0 : i32
    %c0_i32_0 = arith.constant 0 : i32
    %c0_i32_1 = arith.constant 0 : i32
    return %c0_i32, %c0_i32_0 : i32, i32
  }
  func.func @transform_5(%arg0: i32) -> (i32, i32) {
    %c0_i32 = arith.constant 0 : i32
    %c0_i32_0 = arith.constant 0 : i32
    %c0_i32_1 = arith.constant 0 : i32
    return %c0_i32, %c0_i32_0 : i32, i32
  }
  func.func @transform_6(%arg0: i32) -> (i32, i32) {
    %c0_i32 = arith.constant 0 : i32
    %c0_i32_0 = arith.constant 0 : i32
    %c0_i32_1 = arith.constant 0 : i32
    return %c0_i32, %c0_i32_0 : i32, i32
  }
  func.func @transform_7(%arg0: i32) -> (i32, i32) {
    %c0_i32 = arith.constant 0 : i32
    %c0_i32_0 = arith.constant 0 : i32
    %c0_i32_1 = arith.constant 0 : i32
    return %c0_i32, %c0_i32_0 : i32, i32
  }
  func.func @transform_8(%arg0: i32) -> (i32, i32) {
    %c0_i32 = arith.constant 0 : i32
    %c0_i32_0 = arith.constant 0 : i32
    %c0_i32_1 = arith.constant 0 : i32
    return %c0_i32, %c0_i32_0 : i32, i32
  }
  func.func @transform_9(%arg0: i32) -> (i32, i32) {
    %c0_i32 = arith.constant 0 : i32
    %c0_i32_0 = arith.constant 0 : i32
    return %arg0, %c0_i32 : i32, i32
  }
}

</mosaic_0001>

<bundles_post_ra>
// kernel: tpu_custom_call.1
= control target key start
LH: loop header
LB: loop body
LE: loop exit
PB: predicated region body
PF: predicated region fallthrough
CT: control target
= control target key end

     0   :  { %14 = vsyncpa [#allocation3], 0  ;;  %s3688_s0 = inlined_call_operand.hbm [shape: bf16[16,128], index: 0, kind: input, shape index: {}]   ;;  %s3689_s1 = inlined_call_operand.hbm [shape: bf16[128,512], index: 1, kind: input, shape index: {}]   ;;  %s3690_s2 = inlined_call_operand.vmem [shape: f32[1,512], index: 2, kind: input, shape index: {}]   ;;  %s3691_s3 = inlined_call_operand.hbm [shape: bf16[512,512], index: 3, kind: input, shape index: {}]   ;;  %s3692_s4 = inlined_call_operand.vmem [shape: f32[1,512], index: 4, kind: input, shape index: {}]   ;;  %s3693_s5 = inlined_call_operand.hbm [shape: bf16[512,384], index: 5, kind: input, shape index: {}]   ;;  %s3694_s6 = inlined_call_operand.vmem [shape: f32[1,384], index: 6, kind: input, shape index: {}]   ;;  %s3695_s7 = inlined_call_operand.hbm [shape: bf16[384,128], index: 7, kind: input, shape index: {}]   ;;  %s3696_s8 = inlined_call_operand.vmem [shape: f32[1,128], index: 8, kind: input, shape index: {}]   ;;  %s3697_s9 = inlined_call_operand.hbm [shape: f32[16,128], index: 9, kind: output, shape index: {}]  }
   0x1   :  { %15 = vsyncpa [#allocation6], 0 }
   0x2   :  { %16 = vsyncpa [#allocation9], 0 }
   0x3   :  { %17 = vsyncpa [#allocation4], 0  ;;  %s3483_s30 = smov [#allocation5]   ;;  %s3343_s13 = scalar_lea.hbm %s3689_s1, 4096 }
   0x4   :  { %s35_s10 = sshll.u32 %s3483_s30, 4  ;;  %p3344_p0 = scmp.ne.s32.totalorder %s3689_s1, %s3343_s13  ;;  %s36_s10 = int_to_ptr.vmem [resolvable:$true] %s35_s10 }
   0x5   :  { %p3347_p1 = scmp.lt.u32.totalorder %s3343_s13, %s3689_s1 }
   0x7   :  { %p3349_p2 = pnand %p3347_p1, %p3344_p0 }
   0x9   :  { %3352 = shalt.err (!%p3349_p2)
}
   0xa   :  { %s3353_s18 = scalar_lea.vmem %s36_s10, 4096  ;;  %p3358_p4 = scmp.lt.s32.totalorder %s36_s10, %s36_s10 }
   0xb   :  { %p3354_p3 = scmp.ne.s32.totalorder %s36_s10, %s3353_s18  ;;  %p3359_p5 = scmp.lt.s32.totalorder %s3353_s18, %s3353_s18 }
   0xd   :  { %p3360_p6 = por %p3359_p5, %p3358_p4 }
   0xf   :  { %p3361_p7 = pnand %p3360_p6, %p3354_p3 }
  0x11   :  { %3364 = shalt.err (!%p3361_p7)
}
  0x12   :  { %s3484_s19 = smov 256   ;;  %s3485_s20 = smov 16  }
  0x13   :  { %41 = dma.hbm_to_vmem [thread:$0]  %s3689_s1, 4096, %s36_s10, [#allocation6], %s3484_s19, %s3484_s19, %s3485_s20  }
  0x14   :  { %s3486_s23 = smov [#allocation8]   ;;  %s3365_s27 = scalar_lea.hbm %s3693_s5, 12288 }
  0x15   :  { %s63_s24 = sshll.u32 %s3486_s23, 4  ;;  %p3366_p8 = scmp.ne.s32.totalorder %s3693_s5, %s3365_s27  ;;  %s64_s24 = int_to_ptr.vmem [resolvable:$true] %s63_s24 }
  0x16   :  { %p3369_p9 = scmp.lt.u32.totalorder %s3365_s27, %s3693_s5 }
  0x18   :  { %p3371_p10 = pnand %p3369_p9, %p3366_p8 }
  0x1a   :  { %3374 = shalt.err (!%p3371_p10)
}
  0x1b   :  { %s3375_s12 = scalar_lea.vmem %s64_s24, 12288  ;;  %p3380_p12 = scmp.lt.s32.totalorder %s64_s24, %s64_s24 }
  0x1c   :  { %p3376_p11 = scmp.ne.s32.totalorder %s64_s24, %s3375_s12  ;;  %p3381_p13 = scmp.lt.s32.totalorder %s3375_s12, %s3375_s12 }
  0x1e   :  { %p3382_p0 = por %p3381_p13, %p3380_p12 }
  0x20   :  { %p3383_p1 = pnand %p3382_p0, %p3376_p11 }
  0x22   :  { %3386 = shalt.err (!%p3383_p1)
}
  0x23   :  { %s3487_s1 = smov 192   ;;  %s3488_s10 = smov 12  }
  0x24   :  { %69 = dma.hbm_to_vmem [thread:$0]  %s3693_s5, 12288, %s64_s24, [#allocation9], %s3487_s1, %s3487_s1, %s3488_s10  }
  0x25   :  { %s3489_s15 = smov [#allocation2]   ;;  %s3387_s21 = scalar_lea.hbm %s3688_s0, 128 }
  0x26   :  { %s23_s16 = sshll.u32 %s3489_s15, 4  ;;  %p3388_p2 = scmp.ne.s32.totalorder %s3688_s0, %s3387_s21  ;;  %s24_s16 = int_to_ptr.vmem [resolvable:$true] %s23_s16 }
  0x27   :  { %p3391_p3 = scmp.lt.u32.totalorder %s3387_s21, %s3688_s0 }
  0x29   :  { %p3393_p4 = pnand %p3391_p3, %p3388_p2 }
  0x2b   :  { %3396 = shalt.err (!%p3393_p4)
}
  0x2c   :  { %s3397_s27 = scalar_lea.vmem %s24_s16, 128  ;;  %p3402_p6 = scmp.lt.s32.totalorder %s24_s16, %s24_s16 }
  0x2d   :  { %p3398_p5 = scmp.ne.s32.totalorder %s24_s16, %s3397_s27  ;;  %p3403_p7 = scmp.lt.s32.totalorder %s3397_s27, %s3397_s27 }
  0x2f   :  { %p3404_p8 = por %p3403_p7, %p3402_p6 }
  0x31   :  { %p3405_p9 = pnand %p3404_p8, %p3398_p5 }
  0x33   :  { %3408 = shalt.err (!%p3405_p9)
}
  0x34   :  { %s3490_s5 = smov 64   ;;  %s3491_s24 = smov 4  }
  0x35   :  { %29 = dma.hbm_to_vmem [thread:$0]  %s3688_s0, 128, %s24_s16, [#allocation3], %s3490_s5, %s3490_s5, %s3491_s24  }
  0x36   :  { %s3492_s30 = smov [#allocation7]   ;;  %s3493_s12 = smov [#allocation10]  }
  0x37   :  { %s49_s11 = sshll.u32 %s3492_s30, 4  ;;  %s77_s1 = sshll.u32 %s3493_s12, 4  ;;  %s50_s11 = int_to_ptr.vmem [resolvable:$true] %s49_s11  ;;  %s78_s1 = int_to_ptr.vmem [resolvable:$true] %s77_s1 }
  0x38   :  { %s3409_s14 = scalar_lea.hbm %s3691_s3, 16384 }
  0x39   :  { %p3410_p10 = scmp.ne.s32.totalorder %s3691_s3, %s3409_s14  ;;  %p3413_p11 = scmp.lt.u32.totalorder %s3409_s14, %s3691_s3 }
  0x3b   :  { %p3415_p12 = pnand %p3413_p11, %p3410_p10 }
  0x3d   :  { %3418 = shalt.err (!%p3415_p12)
}
  0x3e   :  { %s3419_s0 = scalar_lea.vmem %s50_s11, 16384  ;;  %p3424_p0 = scmp.lt.s32.totalorder %s50_s11, %s50_s11 }
  0x3f   :  { %p3420_p13 = scmp.ne.s32.totalorder %s50_s11, %s3419_s0  ;;  %p3425_p1 = scmp.lt.s32.totalorder %s3419_s0, %s3419_s0 }
  0x41   :  { %p3426_p2 = por %p3425_p1, %p3424_p0 }
  0x43   :  { %p3427_p3 = pnand %p3426_p2, %p3420_p13 }
  0x45   :  { %3430 = shalt.err (!%p3427_p3)
}
  0x46   :  { %55 = dma.hbm_to_vmem [thread:$0]  %s3691_s3, 16384, %s50_s11, [#allocation6], %s3484_s19, %s3484_s19, %s3485_s20  }
  0x47   :  { %s3431_s26 = scalar_lea.hbm %s3695_s7, 3072 }
  0x48   :  { %p3432_p4 = scmp.ne.s32.totalorder %s3695_s7, %s3431_s26  ;;  %p3435_p5 = scmp.lt.u32.totalorder %s3431_s26, %s3695_s7 }
  0x4a   :  { %p3437_p6 = pnand %p3435_p5, %p3432_p4 }
  0x4c   :  { %3440 = shalt.err (!%p3437_p6)
}
  0x4d   :  { %s3441_s12 = scalar_lea.vmem %s78_s1, 3072  ;;  %p3446_p8 = scmp.lt.s32.totalorder %s78_s1, %s78_s1 }
  0x4e   :  { %p3442_p7 = scmp.ne.s32.totalorder %s78_s1, %s3441_s12  ;;  %p3447_p9 = scmp.lt.s32.totalorder %s3441_s12, %s3441_s12 }
  0x50   :  { %p3448_p10 = por %p3447_p9, %p3446_p8 }
  0x52   :  { %p3449_p11 = pnand %p3448_p10, %p3442_p7 }
  0x54   :  { %3452 = shalt.err (!%p3449_p11)
}
  0x55   :  { %83 = dma.hbm_to_vmem [thread:$0]  %s3695_s7, 3072, %s78_s1, [#allocation9], %s3490_s5, %s3490_s5, %s3491_s24  }
  0x56   :  { %3475 = dma.done.wait [#allocation3], 128  }
  0x57   :  { %3476 = vsyncadd [#allocation3], 4294967168 }
  0x58   :  { %3477 = dma.done.wait [#allocation6], 20480  }
  0x59   :  { %3478 = vsyncadd [#allocation6], 4294946816 }
  0x5a   :  { %3479 = dma.done.wait [#allocation9], 15360  }
  0x5b   :  { %3480 = vsyncadd [#allocation9], 4294951936  ;;  %v3494_v0 = vmov 0   ;;  %v2950_v1 = vld [vmem:[#allocation5 + $0x4] ss:$16 sps:$4 sm:$0xff]   ;;  %v2974_v29 = vld [vmem:[#allocation2] sm:$0xff]  }
  0x5c   :  { %356 = vmatprep.mubr.bf16.mxu0 %v3494_v0  ;;  %399 = vmatprep.mubr.bf16.mxu1 %v3494_v0  ;;  %v2952_v2 = vld [vmem:[#allocation5] ss:$16 sps:$4 sm:$0xff]   ;;  %v2953_v3 = vld [vmem:[#allocation5 + $0x24] ss:$16 sps:$4 sm:$0xff]   ;;  %v2975_v10 = vld [vmem:[#allocation5 + $0xc] ss:$16 sps:$4 sm:$0xff]  }
  0x5d   :  { %324 = vmatprep.subr.bf16.mxu0 %v2950_v1  ;;  %v2955_v4 = vld [vmem:[#allocation5 + $0x20] ss:$16 sps:$4 sm:$0xff]   ;;  %v2956_v5 = vld [vmem:[#allocation5 + $0x44] ss:$16 sps:$4 sm:$0xff]   ;;  %v2977_v11 = vld [vmem:[#allocation5 + $0x8] ss:$16 sps:$4 sm:$0xff]   ;;  %367 = vmatprep.subr.bf16.mxu1 %v2975_v10 }
  0x5e   :  { %325 = vmatpush1.bf16.msra.mxu0 %v2952_v2  ;;  %v2958_v6 = vld [vmem:[#allocation5 + $0x40] ss:$16 sps:$4 sm:$0xff]   ;;  %v2959_v7 = vld [vmem:[#allocation5 + $0x64] ss:$16 sps:$4 sm:$0xff]   ;;  %v2978_v12 = vld [vmem:[#allocation5 + $0x2c] ss:$16 sps:$4 sm:$0xff]   ;;  %368 = vmatpush1.bf16.msra.mxu1 %v2977_v11 }
  0x5f   :  { %326 = vmatprep.subr.bf16.mxu0 %v2953_v3  ;;  %v2961_v8 = vld [vmem:[#allocation5 + $0x60] ss:$16 sps:$4 sm:$0xff]   ;;  %v2962_v9 = vld [vmem:[#allocation5 + $0x84] ss:$16 sps:$4 sm:$0xff]   ;;  %v2980_v14 = vld [vmem:[#allocation5 + $0x28] ss:$16 sps:$4 sm:$0xff]   ;;  %369 = vmatprep.subr.bf16.mxu1 %v2978_v12 }
  0x60   :  { %v2964_v13 = vld [vmem:[#allocation5 + $0x80] ss:$16 sps:$4 sm:$0xff]   ;;  %v2965_v15 = vld [vmem:[#allocation5 + $0xa4] ss:$16 sps:$4 sm:$0xff]   ;;  %v2981_v16 = vld [vmem:[#allocation5 + $0x4c] ss:$16 sps:$4 sm:$0xff]  }
  0x61   :  { %v2967_v17 = vld [vmem:[#allocation5 + $0xa0] ss:$16 sps:$4 sm:$0xff]   ;;  %v2983_v18 = vld [vmem:[#allocation5 + $0x48] ss:$16 sps:$4 sm:$0xff]   ;;  %v2968_v19 = vld [vmem:[#allocation5 + $0xc4] ss:$16 sps:$4 sm:$0xff]  }
  0x62   :  { %327 = vmatpush1.bf16.msra.mxu0 %v2955_v4  ;;  %370 = vmatpush1.bf16.msra.mxu1 %v2980_v14  ;;  %v2984_v20 = vld [vmem:[#allocation5 + $0x6c] ss:$16 sps:$4 sm:$0xff]   ;;  %v2970_v21 = vld [vmem:[#allocation5 + $0xc0] ss:$16 sps:$4 sm:$0xff]   ;;  %v2986_v22 = vld [vmem:[#allocation5 + $0x68] ss:$16 sps:$4 sm:$0xff]  }
  0x63   :  { %328 = vmatprep.subr.bf16.mxu0 %v2956_v5  ;;  %371 = vmatprep.subr.bf16.mxu1 %v2981_v16  ;;  %v2971_v23 = vld [vmem:[#allocation5 + $0xe4] ss:$16 sps:$4 sm:$0xff]   ;;  %v2987_v24 = vld [vmem:[#allocation5 + $0x8c] ss:$16 sps:$4 sm:$0xff]   ;;  %v2973_v25 = vld [vmem:[#allocation5 + $0xe0] ss:$16 sps:$4 sm:$0xff]  }
  0x64   :  { %v2989_v26 = vld [vmem:[#allocation5 + $0x88] ss:$16 sps:$4 sm:$0xff]   ;;  %v2990_v27 = vld [vmem:[#allocation5 + $0xac] ss:$16 sps:$4 sm:$0xff]   ;;  %v3001_v28 = vld [vmem:[#allocation7 + $0x4] ss:$16 sps:$4 sm:$0xff]  }
  0x65   :  { %v2992_v30 = vld [vmem:[#allocation5 + $0xa8] ss:$16 sps:$4 sm:$0xff]   ;;  %v2999_v31 = vld [vmem:[#allocation7] ss:$16 sps:$4 sm:$0xff]   ;;  %v2993_v32 = vld [vmem:[#allocation5 + $0xcc] ss:$16 sps:$4 sm:$0xff]  }
  0x66   :  { %329 = vmatpush1.bf16.msra.mxu0 %v2958_v6  ;;  %372 = vmatpush1.bf16.msra.mxu1 %v2983_v18  ;;  %v3007_v33 = vld [vmem:[#allocation7 + $0x24] ss:$16 sps:$4 sm:$0xff]   ;;  %v2995_v34 = vld [vmem:[#allocation5 + $0xc8] ss:$16 sps:$4 sm:$0xff]   ;;  %v3005_v35 = vld [vmem:[#allocation7 + $0x20] ss:$16 sps:$4 sm:$0xff]  }
  0x67   :  { %330 = vmatprep.subr.bf16.mxu0 %v2959_v7  ;;  %373 = vmatprep.subr.bf16.mxu1 %v2984_v20  ;;  %v2996_v36 = vld [vmem:[#allocation5 + $0xec] ss:$16 sps:$4 sm:$0xff]   ;;  %v3013_v37 = vld [vmem:[#allocation7 + $0x44] ss:$16 sps:$4 sm:$0xff]   ;;  %v2998_v38 = vld [vmem:[#allocation5 + $0xe8] ss:$16 sps:$4 sm:$0xff]  }
  0x68   :  { %v3011_v39 = vld [vmem:[#allocation7 + $0x40] ss:$16 sps:$4 sm:$0xff]   ;;  %v3004_v40 = vld [vmem:[#allocation7 + $0xc] ss:$16 sps:$4 sm:$0xff]   ;;  %v3019_v41 = vld [vmem:[#allocation7 + $0x64] ss:$16 sps:$4 sm:$0xff]  }
  0x69   :  { %v3002_v42 = vld [vmem:[#allocation7 + $0x8] ss:$16 sps:$4 sm:$0xff]   ;;  %v3017_v43 = vld [vmem:[#allocation7 + $0x60] ss:$16 sps:$4 sm:$0xff]   ;;  %v3010_v44 = vld [vmem:[#allocation7 + $0x2c] ss:$16 sps:$4 sm:$0xff]  }
  0x6a   :  { %331 = vmatpush1.bf16.msra.mxu0 %v2961_v8  ;;  %374 = vmatpush1.bf16.msra.mxu1 %v2986_v22  ;;  %v3025_v45 = vld [vmem:[#allocation7 + $0x84] ss:$16 sps:$4 sm:$0xff]   ;;  %v3008_v46 = vld [vmem:[#allocation7 + $0x28] ss:$16 sps:$4 sm:$0xff]   ;;  %v3023_v47 = vld [vmem:[#allocation7 + $0x80] ss:$16 sps:$4 sm:$0xff]  }
  0x6b   :  { %332 = vmatprep.subr.bf16.mxu0 %v2962_v9  ;;  %375 = vmatprep.subr.bf16.mxu1 %v2987_v24  ;;  %v3016_v48 = vld [vmem:[#allocation7 + $0x4c] ss:$16 sps:$4 sm:$0xff]   ;;  %v3031_v49 = vld [vmem:[#allocation7 + $0xa4] ss:$16 sps:$4 sm:$0xff]   ;;  %v3014_v50 = vld [vmem:[#allocation7 + $0x48] ss:$16 sps:$4 sm:$0xff]  }
  0x6c   :  { %v3029_v51 = vld [vmem:[#allocation7 + $0xa0] ss:$16 sps:$4 sm:$0xff]   ;;  %v3022_v52 = vld [vmem:[#allocation7 + $0x6c] ss:$16 sps:$4 sm:$0xff]   ;;  %v3037_v53 = vld [vmem:[#allocation7 + $0xc4] ss:$16 sps:$4 sm:$0xff]  }
  0x6d   :  { %v3020_v54 = vld [vmem:[#allocation7 + $0x68] ss:$16 sps:$4 sm:$0xff]   ;;  %v3035_v55 = vld [vmem:[#allocation7 + $0xc0] ss:$16 sps:$4 sm:$0xff]   ;;  %v3028_v56 = vld [vmem:[#allocation7 + $0x8c] ss:$16 sps:$4 sm:$0xff]  }
  0x6e   :  { %333 = vmatpush1.bf16.msra.mxu0 %v2964_v13  ;;  %376 = vmatpush1.bf16.msra.mxu1 %v2989_v26  ;;  %v3043_v57 = vld [vmem:[#allocation7 + $0xe4] ss:$16 sps:$4 sm:$0xff]   ;;  %v3026_v58 = vld [vmem:[#allocation7 + $0x88] ss:$16 sps:$4 sm:$0xff]   ;;  %v3034_v59 = vld [vmem:[#allocation7 + $0xac] ss:$16 sps:$4 sm:$0xff]  }
  0x6f   :  { %334 = vmatprep.subr.bf16.mxu0 %v2965_v15  ;;  %377 = vmatprep.subr.bf16.mxu1 %v2990_v27  ;;  %v3041_v60 = vld [vmem:[#allocation7 + $0xe0] ss:$16 sps:$4 sm:$0xff]   ;;  %v3049_v61 = vld [vmem:[#allocation7 + $0x104] ss:$16 sps:$4 sm:$0xff]   ;;  %v3032_v62 = vld [vmem:[#allocation7 + $0xa8] ss:$16 sps:$4 sm:$0xff]  }
  0x70   :  { %v3047_v63 = vld [vmem:[#allocation7 + $0x100] ss:$16 sps:$4 sm:$0xff]   ;;  %v3040_v0 = vld [vmem:[#allocation7 + $0xcc] ss:$16 sps:$4 sm:$0xff]   ;;  %v3055_v1 = vld [vmem:[#allocation7 + $0x124] ss:$16 sps:$4 sm:$0xff]  }
  0x71   :  { %v3038_v2 = vld [vmem:[#allocation7 + $0xc8] ss:$16 sps:$4 sm:$0xff]   ;;  %v3053_v3 = vld [vmem:[#allocation7 + $0x120] ss:$16 sps:$4 sm:$0xff]   ;;  %v3046_v4 = vld [vmem:[#allocation7 + $0xec] ss:$16 sps:$4 sm:$0xff]  }
  0x72   :  { %335 = vmatpush1.bf16.msra.mxu0 %v2967_v17  ;;  %378 = vmatpush1.bf16.msra.mxu1 %v2992_v30  ;;  %v3061_v5 = vld [vmem:[#allocation7 + $0x144] ss:$16 sps:$4 sm:$0xff]   ;;  %v3044_v6 = vld [vmem:[#allocation7 + $0xe8] ss:$16 sps:$4 sm:$0xff]   ;;  %v3059_v7 = vld [vmem:[#allocation7 + $0x140] ss:$16 sps:$4 sm:$0xff]  }
  0x73   :  { %336 = vmatprep.subr.bf16.mxu0 %v2968_v19  ;;  %379 = vmatprep.subr.bf16.mxu1 %v2993_v32  ;;  %v3052_v8 = vld [vmem:[#allocation7 + $0x10c] ss:$16 sps:$4 sm:$0xff]   ;;  %v3067_v9 = vld [vmem:[#allocation7 + $0x164] ss:$16 sps:$4 sm:$0xff]   ;;  %v3050_v10 = vld [vmem:[#allocation7 + $0x108] ss:$16 sps:$4 sm:$0xff]  }
  0x74   :  { %v3065_v11 = vld [vmem:[#allocation7 + $0x160] ss:$16 sps:$4 sm:$0xff]   ;;  %v3058_v12 = vld [vmem:[#allocation7 + $0x12c] ss:$16 sps:$4 sm:$0xff]   ;;  %v3073_v13 = vld [vmem:[#allocation7 + $0x184] ss:$16 sps:$4 sm:$0xff]  }
  0x75   :  { %v3056_v14 = vld [vmem:[#allocation7 + $0x128] ss:$16 sps:$4 sm:$0xff]   ;;  %v3071_v15 = vld [vmem:[#allocation7 + $0x180] ss:$16 sps:$4 sm:$0xff]   ;;  %v3064_v16 = vld [vmem:[#allocation7 + $0x14c] ss:$16 sps:$4 sm:$0xff]  }
  0x76   :  { %337 = vmatpush1.bf16.msra.mxu0 %v2970_v21  ;;  %380 = vmatpush1.bf16.msra.mxu1 %v2995_v34  ;;  %v3079_v17 = vld [vmem:[#allocation7 + $0x1a4] ss:$16 sps:$4 sm:$0xff]   ;;  %v3062_v18 = vld [vmem:[#allocation7 + $0x148] ss:$16 sps:$4 sm:$0xff]   ;;  %v3077_v19 = vld [vmem:[#allocation7 + $0x1a0] ss:$16 sps:$4 sm:$0xff]  }
  0x77   :  { %338 = vmatprep.subr.bf16.mxu0 %v2971_v23  ;;  %381 = vmatprep.subr.bf16.mxu1 %v2996_v36  ;;  %v3070_v20 = vld [vmem:[#allocation7 + $0x16c] ss:$16 sps:$4 sm:$0xff]   ;;  %v3068_v21 = vld [vmem:[#allocation7 + $0x168] ss:$16 sps:$4 sm:$0xff]   ;;  %v3085_v26 = vld [vmem:[#allocation7 + $0x1c4] ss:$16 sps:$4 sm:$0xff]   ;;  %v138_v36 = vlaneseq }
  0x78   :  { %v3076_v22 = vld [vmem:[#allocation7 + $0x18c] ss:$16 sps:$4 sm:$0xff]   ;;  %v3074_v23 = vld [vmem:[#allocation7 + $0x188] ss:$16 sps:$4 sm:$0xff]   ;;  %v3091_v30 = vld [vmem:[#allocation7 + $0x1e4] ss:$16 sps:$4 sm:$0xff]  }
  0x79   :  { %v3082_v24 = vld [vmem:[#allocation7 + $0x1ac] ss:$16 sps:$4 sm:$0xff]   ;;  %v3089_v32 = vld [vmem:[#allocation7 + $0x1e0] ss:$16 sps:$4 sm:$0xff]   ;;  %v3097_v34 = vld [vmem:[#allocation7 + $0x204] ss:$16 sps:$4 sm:$0xff]  }
  0x7a   :  { %339 = vmatpush1.bf16.msra.mxu0 %v2973_v25  ;;  %382 = vmatpush1.bf16.msra.mxu1 %v2998_v38  ;;  %v3080_v25 = vld [vmem:[#allocation7 + $0x1a8] ss:$16 sps:$4 sm:$0xff]   ;;  %v3088_v27 = vld [vmem:[#allocation7 + $0x1cc] ss:$16 sps:$4 sm:$0xff]   ;;  %vm3496_vm0 = vmmov 0   ;;  %s3497_s1 = smov [#allocation11]  }
  0x7b   :  { %1212 = vmatprep.subr.bf16.mxu0 %v3001_v28  ;;  %1298 = vmatprep.subr.bf16.mxu1 %v3004_v40  ;;  %v3083_v28 = vld [vmem:[#allocation7 + $0x1c0] ss:$16 sps:$4 sm:$0xff]   ;;  %s2518_s10 = sshll.u32 %s3497_s1, 4  ;;  %s2519_s10 = int_to_ptr.vmem [resolvable:$true] %s2518_s10 }
  0x7c   :  { %s3453_s13 = scalar_lea.vmem %s2519_s10, 256  ;;  %p3458_p13 = scmp.lt.s32.totalorder %s2519_s10, %s2519_s10 }
  0x7d   :  { %357 = vmatmul.mubr.bf16.vlgmr.msra.gmra.mrb[0].mxu0 %v2974_v29  ;;  %400 = vmatmul.mubr.bf16.vlgmr.msra.gmra.mrb[0].mxu1 %v2974_v29  ;;  %v3086_v29 = vld [vmem:[#allocation7 + $0x1c8] ss:$16 sps:$4 sm:$0xff]   ;;  %p3454_p12 = scmp.ne.s32.totalorder %s2519_s10, %s3453_s13  ;;  %p3459_p0 = scmp.lt.s32.totalorder %s3453_s13, %s3453_s13 }
  0x7e   :  { %1213 = vmatpush1.bf16.msra.mxu0 %v2999_v31  ;;  %1299 = vmatpush1.bf16.msra.mxu1 %v3002_v42  ;;  %v3094_v31 = vld [vmem:[#allocation7 + $0x1ec] ss:$16 sps:$4 sm:$0xff]  }
  0x7f   :  { %1214 = vmatprep.subr.bf16.mxu0 %v3007_v33  ;;  %1300 = vmatprep.subr.bf16.mxu1 %v3010_v44  ;;  %v3092_v33 = vld [vmem:[#allocation7 + $0x1e8] ss:$16 sps:$4 sm:$0xff]   ;;  %p3460_p1 = por %p3459_p0, %p3458_p13 }
  0x81   :  { %p3461_p2 = pnand %p3460_p1, %p3454_p12 }
  0x82   :  { %1215 = vmatpush1.bf16.msra.mxu0 %v3005_v35  ;;  %1301 = vmatpush1.bf16.msra.mxu1 %v3008_v46  ;;  %v3100_v35 = vld [vmem:[#allocation7 + $0x20c] ss:$16 sps:$4 sm:$0xff]  }
  0x83   :  { %1216 = vmatprep.subr.bf16.mxu0 %v3013_v37  ;;  %1302 = vmatprep.subr.bf16.mxu1 %v3016_v48  ;;  %v3622_v37 = vshrl.u32 %v138_v36, 7  ;;  %v3134_v36 = vld [vmem:[#allocation7 + $0x2c8] ss:$16 sps:$4 sm:$0xff]  }
  0x85   :  { %v3625_v38 = vsub.s32 0, %v3622_v37  ;;  %v3631_v40 = vsub.s32 1, %v3622_v37 }
  0x86   :  { %1217 = vmatpush1.bf16.msra.mxu0 %v3011_v39  ;;  %1303 = vmatpush1.bf16.msra.mxu1 %v3014_v50  ;;  %v136_v39 = vld [vmem:[%s3690_s2] sm:$0xf] }
  0x87   :  { %1218 = vmatprep.subr.bf16.mxu0 %v3019_v41  ;;  %1304 = vmatprep.subr.bf16.mxu1 %v3022_v52  ;;  %v141_v41 = vrot.slane %v136_v39, %v3625_v38  ;;  %v145_v42 = vrot.slane %v136_v39, %v3631_v40 }
  0x8a   :  { %1219 = vmatpush1.bf16.msra.mxu0 %v3017_v43  ;;  %1305 = vmatpush1.bf16.msra.mxu1 %v3020_v54 }
  0x8b   :  { %1220 = vmatprep.subr.bf16.mxu0 %v3025_v45  ;;  %1306 = vmatprep.subr.bf16.mxu1 %v3028_v56  ;;  %v152_v56 = vsub.s32 3, %v3622_v37 }
  0x8e   :  { %1221 = vmatpush1.bf16.msra.mxu0 %v3023_v47  ;;  %1307 = vmatpush1.bf16.msra.mxu1 %v3026_v58 }
  0x8f   :  { %1222 = vmatprep.subr.bf16.mxu0 %v3031_v49  ;;  %1308 = vmatprep.subr.bf16.mxu1 %v3034_v59  ;;  %v3095_v59 = vld [vmem:[#allocation7 + $0x200] ss:$16 sps:$4 sm:$0xff]  }
  0x92   :  { %1223 = vmatpush1.bf16.msra.mxu0 %v3029_v51  ;;  %1309 = vmatpush1.bf16.msra.mxu1 %v3032_v62  ;;  %v3106_v62 = vld [vmem:[#allocation7 + $0x22c] ss:$16 sps:$4 sm:$0xff]  }
  0x93   :  { %1224 = vmatprep.subr.bf16.mxu0 %v3037_v53  ;;  %1310 = vmatprep.subr.bf16.mxu1 %v3040_v0  ;;  %v3636_v53 = vsub.s32 2, %v3622_v37  ;;  %v153_v0 = vrot.slane %v136_v39, %v152_v56 }
  0x96   :  { %1225 = vmatpush1.bf16.msra.mxu0 %v3035_v55  ;;  %1311 = vmatpush1.bf16.msra.mxu1 %v3038_v2  ;;  %v3104_v2 = vld [vmem:[#allocation7 + $0x228] ss:$16 sps:$4 sm:$0xff]  }
  0x97   :  { %1226 = vmatprep.subr.bf16.mxu0 %v3043_v57  ;;  %1312 = vmatprep.subr.bf16.mxu1 %v3046_v4  ;;  %v3109_v4 = vld [vmem:[#allocation7 + $0x244] ss:$16 sps:$4 sm:$0xff]  }
  0x9a   :  { %1227 = vmatpush1.bf16.msra.mxu0 %v3041_v60  ;;  %1313 = vmatpush1.bf16.msra.mxu1 %v3044_v6  ;;  %v3098_v60 = vld [vmem:[#allocation7 + $0x208] ss:$16 sps:$4 sm:$0xff]  }
  0x9b   :  { %1228 = vmatprep.subr.bf16.mxu0 %v3049_v61  ;;  %1314 = vmatprep.subr.bf16.mxu1 %v3052_v8  ;;  %v3103_v61 = vld [vmem:[#allocation7 + $0x224] ss:$16 sps:$4 sm:$0xff]  }
  0x9e   :  { %1229 = vmatpush1.bf16.msra.mxu0 %v3047_v63  ;;  %1315 = vmatpush1.bf16.msra.mxu1 %v3050_v10  ;;  %v149_v63 = vrot.slane %v136_v39, %v3636_v53  ;;  %v3139_v39 = vld [vmem:[#allocation7 + $0x2e4] ss:$16 sps:$4 sm:$0xff]  }
  0x9f   :  { %1230 = vmatprep.subr.bf16.mxu0 %v3055_v1  ;;  %1316 = vmatprep.subr.bf16.mxu1 %v3058_v12  ;;  %v3101_v1 = vld [vmem:[#allocation7 + $0x220] ss:$16 sps:$4 sm:$0xff]  }
  0xa2   :  { %1231 = vmatpush1.bf16.msra.mxu0 %v3053_v3  ;;  %1317 = vmatpush1.bf16.msra.mxu1 %v3056_v14  ;;  %v3110_v14 = vld [vmem:[#allocation7 + $0x248] ss:$16 sps:$4 sm:$0xff]  }
  0xa3   :  { %1232 = vmatprep.subr.bf16.mxu0 %v3061_v5  ;;  %1318 = vmatprep.subr.bf16.mxu1 %v3064_v16  ;;  %v3112_v5 = vld [vmem:[#allocation7 + $0x24c] ss:$16 sps:$4 sm:$0xff]  }
  0xa6   :  { %1233 = vmatpush1.bf16.msra.mxu0 %v3059_v7  ;;  %1319 = vmatpush1.bf16.msra.mxu1 %v3062_v18  ;;  %v3118_v18 = vld [vmem:[#allocation7 + $0x26c] ss:$16 sps:$4 sm:$0xff]  }
  0xa7   :  { %1234 = vmatprep.subr.bf16.mxu0 %v3067_v9  ;;  %1320 = vmatprep.subr.bf16.mxu1 %v3070_v20 }
  0xaa   :  { %1235 = vmatpush1.bf16.msra.mxu0 %v3065_v11  ;;  %1321 = vmatpush1.bf16.msra.mxu1 %v3068_v21 }
  0xab   :  { %1236 = vmatprep.subr.bf16.mxu0 %v3073_v13  ;;  %1322 = vmatprep.subr.bf16.mxu1 %v3076_v22  ;;  %v3107_v13 = vld [vmem:[#allocation7 + $0x240] ss:$16 sps:$4 sm:$0xff]  }
  0xac   :  { %v3113_v22 = vld [vmem:[#allocation7 + $0x260] ss:$16 sps:$4 sm:$0xff]  }
  0xae   :  { %1237 = vmatpush1.bf16.msra.mxu0 %v3071_v15  ;;  %1323 = vmatpush1.bf16.msra.mxu1 %v3074_v23  ;;  %v3116_v23 = vld [vmem:[#allocation7 + $0x268] ss:$16 sps:$4 sm:$0xff]  }
  0xaf   :  { %1238 = vmatprep.subr.bf16.mxu0 %v3079_v17  ;;  %1324 = vmatprep.subr.bf16.mxu1 %v3082_v24  ;;  %v3115_v17 = vld [vmem:[#allocation7 + $0x264] ss:$16 sps:$4 sm:$0xff]  }
  0xb2   :  { %1239 = vmatpush1.bf16.msra.mxu0 %v3077_v19  ;;  %1325 = vmatpush1.bf16.msra.mxu1 %v3080_v25  ;;  %v3121_v25 = vld [vmem:[#allocation7 + $0x284] ss:$16 sps:$4 sm:$0xff]  }
  0xb3   :  { %1240 = vmatprep.subr.bf16.mxu0 %v3085_v26  ;;  %1326 = vmatprep.subr.bf16.mxu1 %v3088_v27  ;;  %v3124_v26 = vld [vmem:[#allocation7 + $0x28c] ss:$16 sps:$4 sm:$0xff]   ;;  %v3119_v27 = vld [vmem:[#allocation7 + $0x280] ss:$16 sps:$4 sm:$0xff]  }
  0xb6   :  { %1241 = vmatpush1.bf16.msra.mxu0 %v3083_v28  ;;  %1327 = vmatpush1.bf16.msra.mxu1 %v3086_v29  ;;  %v3122_v28 = vld [vmem:[#allocation7 + $0x288] ss:$16 sps:$4 sm:$0xff]   ;;  %v3127_v29 = vld [vmem:[#allocation7 + $0x2a4] ss:$16 sps:$4 sm:$0xff]  }
  0xb7   :  { %1242 = vmatprep.subr.bf16.mxu0 %v3091_v30  ;;  %1328 = vmatprep.subr.bf16.mxu1 %v3094_v31  ;;  %v3130_v30 = vld [vmem:[#allocation7 + $0x2ac] ss:$16 sps:$4 sm:$0xff]   ;;  %v3125_v31 = vld [vmem:[#allocation7 + $0x2a0] ss:$16 sps:$4 sm:$0xff]  }
  0xba   :  { %1243 = vmatpush1.bf16.msra.mxu0 %v3089_v32  ;;  %1329 = vmatpush1.bf16.msra.mxu1 %v3092_v33  ;;  %v3128_v32 = vld [vmem:[#allocation7 + $0x2a8] ss:$16 sps:$4 sm:$0xff]   ;;  %v3133_v33 = vld [vmem:[#allocation7 + $0x2c4] ss:$16 sps:$4 sm:$0xff]  }
  0xbb   :  { %1255 = vmatprep.subr.bf16.mxu0 %v3097_v34  ;;  %1341 = vmatprep.subr.bf16.mxu1 %v3100_v35  ;;  %v3136_v34 = vld [vmem:[#allocation7 + $0x2cc] ss:$16 sps:$4 sm:$0xff]   ;;  %v3131_v35 = vld [vmem:[#allocation7 + $0x2c0] ss:$16 sps:$4 sm:$0xff]  }
 0x150   :  { %v358_v43 = vpop.f32.mrb[0].mxu0  ;;  %v401_v3 = vpop.f32.mrb[0].mxu1 }
 0x151   :  { %v359_v44 = vadd.f32 %v358_v43, %v141_v41  ;;  %v360_v45 = vpop.f32.mrb[1].mxu0  ;;  %v402_v6 = vadd.f32 %v401_v3, %v149_v63  ;;  %v403_v7 = vpop.f32.mrb[1].mxu1  ;;  %v3140_v43 = vld [vmem:[#allocation7 + $0x2e8] ss:$16 sps:$4 sm:$0xff]   ;;  %v3178_v3 = vld [vmem:[#allocation7 + $0x3ac] ss:$16 sps:$4 sm:$0xff]  }
 0x152   :  { %v361_v46 = vadd.f32 %v360_v45, %v145_v42  ;;  %v362_v47 = vpop.f32.mrb[2].mxu0  ;;  %v404_v8 = vadd.f32 %v403_v7, %v153_v0  ;;  %v405_v9 = vpop.f32.mrb[2].mxu1  ;;  %v3148_v45 = vld [vmem:[#allocation7 + $0x30c] ss:$16 sps:$4 sm:$0xff]  }
 0x153   :  { %v363_v48 = vadd.f32 %v362_v47, %v141_v41  ;;  %v364_v49 = vpop.f32.mrb[3].mxu0  ;;  %v410_v51 = vmax.f32 %v359_v44, 0.0  ;;  %v412_v10 = vmax.f32 %v402_v6, 0.0  ;;  %v406_v11 = vadd.f32 %v405_v9, %v149_v63  ;;  %v407_v12 = vpop.f32.mrb[3].mxu1  ;;  %v3142_v41 = vld [vmem:[#allocation7 + $0x2ec] ss:$16 sps:$4 sm:$0xff]  }
 0x154   :  { %v365_v50 = vadd.f32 %v364_v49, %v145_v42  ;;  %v411_v54 = vmax.f32 %v361_v46, 0.0  ;;  %v413_v15 = vmax.f32 %v404_v8, 0.0  ;;  %v408_v16 = vadd.f32 %v407_v12, %v153_v0  ;;  %v3137_v42 = vld [vmem:[#allocation7 + $0x2e0] ss:$16 sps:$4 sm:$0xff]   ;;  %v3145_v44 = vld [vmem:[#allocation7 + $0x304] ss:$16 sps:$4 sm:$0xff]  }
 0x155   :  { %v414_v52 = vmax.f32 %v363_v48, 0.0  ;;  %v416_v19 = vmax.f32 %v406_v11, 0.0  ;;  %v3143_v46 = vld [vmem:[#allocation7 + $0x300] ss:$16 sps:$4 sm:$0xff]   ;;  %v3146_v47 = vld [vmem:[#allocation7 + $0x308] ss:$16 sps:$4 sm:$0xff]  }
 0x156   :  { %v415_v55 = vmax.f32 %v365_v50, 0.0  ;;  %v417_v20 = vmax.f32 %v408_v16, 0.0  ;;  %v3151_v48 = vld [vmem:[#allocation7 + $0x324] ss:$16 sps:$4 sm:$0xff]   ;;  %v3154_v49 = vld [vmem:[#allocation7 + $0x32c] ss:$16 sps:$4 sm:$0xff]  }
 0x157   :  { %v418_v57 = vpack.c.bf16 %v414_v52, %v410_v51  ;;  %v3642_v21 = vpack.c.bf16 %v416_v19, %v412_v10  ;;  %v3149_v50 = vld [vmem:[#allocation7 + $0x320] ss:$16 sps:$4 sm:$0xff]   ;;  %v3152_v51 = vld [vmem:[#allocation7 + $0x328] ss:$16 sps:$4 sm:$0xff]   ;;  %v3157_v52 = vld [vmem:[#allocation7 + $0x344] ss:$16 sps:$4 sm:$0xff]  }
 0x158   :  { %v419_v58 = vpack.c.bf16 %v415_v55, %v411_v54  ;;  %v421_v24 = vpack.c.bf16 %v417_v20, %v413_v15  ;;  %v3160_v54 = vld [vmem:[#allocation7 + $0x34c] ss:$16 sps:$4 sm:$0xff]   ;;  %v3155_v55 = vld [vmem:[#allocation7 + $0x340] ss:$16 sps:$4 sm:$0xff]   ;;  %v3181_v6 = vld [vmem:[#allocation7 + $0x3c4] ss:$16 sps:$4 sm:$0xff]  }
 0x159   :  { %v3172_v63 = vld [vmem:[#allocation7 + $0x38c] ss:$16 sps:$4 sm:$0xff]   ;;  %v3167_v0 = vld [vmem:[#allocation7 + $0x380] ss:$16 sps:$4 sm:$0xff]   ;;  %v3182_v9 = vld [vmem:[#allocation7 + $0x3c8] ss:$16 sps:$4 sm:$0xff]  }
 0x15a   :  { %1244 = vmatprep.mubr.bf16.mxu0 %v419_v58  ;;  %1330 = vmatprep.mubr.bf16.mxu1 %v419_v58  ;;  %v3163_v58 = vld [vmem:[#allocation7 + $0x364] ss:$16 sps:$4 sm:$0xff]   ;;  %v3184_v7 = vld [vmem:[#allocation7 + $0x3cc] ss:$16 sps:$4 sm:$0xff]   ;;  %v3179_v8 = vld [vmem:[#allocation7 + $0x3c0] ss:$16 sps:$4 sm:$0xff]  }
 0x15b   :  { %1245 = vmatmul.mubr.bf16.vlgmr.msra.gmra.mrb[4].mxu0 %v418_v57  ;;  %1331 = vmatmul.mubr.bf16.vlgmr.msra.gmra.mrb[4].mxu1 %v418_v57  ;;  %v3158_v57 = vld [vmem:[#allocation7 + $0x348] ss:$16 sps:$4 sm:$0xff]   ;;  %v3187_v10 = vld [vmem:[#allocation7 + $0x3e4] ss:$16 sps:$4 sm:$0xff]   ;;  %v3190_v11 = vld [vmem:[#allocation7 + $0x3ec] ss:$16 sps:$4 sm:$0xff]  }
 0x15c   :  { %1256 = vmatpush1.bf16.msra.mxu0 %v3095_v59  ;;  %1342 = vmatpush1.bf16.msra.mxu1 %v3098_v60  ;;  %v3166_v59 = vld [vmem:[#allocation7 + $0x36c] ss:$16 sps:$4 sm:$0xff]   ;;  %v3161_v60 = vld [vmem:[#allocation7 + $0x360] ss:$16 sps:$4 sm:$0xff]   ;;  %v3218_v15 = vld [vmem:[#allocation8 + $0xc8] ss:$12 sps:$4 sm:$0xff]  }
 0x15d   :  { %1257 = vmatprep.subr.bf16.mxu0 %v3103_v61  ;;  %1343 = vmatprep.subr.bf16.mxu1 %v3106_v62  ;;  %v3164_v61 = vld [vmem:[#allocation7 + $0x368] ss:$16 sps:$4 sm:$0xff]   ;;  %v3169_v62 = vld [vmem:[#allocation7 + $0x384] ss:$16 sps:$4 sm:$0xff]   ;;  %v3185_v12 = vld [vmem:[#allocation7 + $0x3e0] ss:$16 sps:$4 sm:$0xff]  }
 0x15e   :  { %1287 = vmatprep.mubr.bf16.mxu0 %v421_v24  ;;  %1373 = vmatprep.mubr.bf16.mxu1 %v421_v24  ;;  %v3191_v16 = vld [vmem:[#allocation8] ss:$12 sps:$4 sm:$0xff]   ;;  %v3194_v20 = vld [vmem:[#allocation8 + $0x18] ss:$12 sps:$4 sm:$0xff]  }
 0x15f   :  { %v3223_v19 = vld [vmem:[#allocation8 + $0xe0] ss:$12 sps:$4 sm:$0xff]   ;;  %v3228_v24 = vld [vmem:[#allocation8 + $0xf8] ss:$12 sps:$4 sm:$0xff]  }
 0x160   :  { %1258 = vmatpush1.bf16.msra.mxu0 %v3101_v1  ;;  %1344 = vmatpush1.bf16.msra.mxu1 %v3104_v2  ;;  %v3170_v1 = vld [vmem:[#allocation7 + $0x388] ss:$16 sps:$4 sm:$0xff]   ;;  %v3175_v2 = vld [vmem:[#allocation7 + $0x3a4] ss:$16 sps:$4 sm:$0xff]  }
 0x161   :  { %1259 = vmatprep.subr.bf16.mxu0 %v3109_v4  ;;  %1345 = vmatprep.subr.bf16.mxu1 %v3112_v5  ;;  %v3173_v4 = vld [vmem:[#allocation7 + $0x3a0] ss:$16 sps:$4 sm:$0xff]   ;;  %v3176_v5 = vld [vmem:[#allocation7 + $0x3a8] ss:$16 sps:$4 sm:$0xff]  }
 0x164   :  { %1260 = vmatpush1.bf16.msra.mxu0 %v3107_v13  ;;  %1346 = vmatpush1.bf16.msra.mxu1 %v3110_v14  ;;  %v3188_v13 = vld [vmem:[#allocation7 + $0x3e8] ss:$16 sps:$4 sm:$0xff]   ;;  %v3193_v14 = vld [vmem:[#allocation8 + $0x4] ss:$12 sps:$4 sm:$0xff]  }
 0x165   :  { %1261 = vmatprep.subr.bf16.mxu0 %v3115_v17  ;;  %1347 = vmatprep.subr.bf16.mxu1 %v3118_v18  ;;  %v3219_v17 = vld [vmem:[#allocation8 + $0x8] ss:$12 sps:$4 sm:$0xff]  }
 0x166   :  { %v3196_v18 = vld [vmem:[#allocation8 + $0x1c] ss:$12 sps:$4 sm:$0xff]  }
 0x168   :  { %1262 = vmatpush1.bf16.msra.mxu0 %v3113_v22  ;;  %1348 = vmatpush1.bf16.msra.mxu1 %v3116_v23  ;;  %v3224_v22 = vld [vmem:[#allocation8 + $0x20] ss:$12 sps:$4 sm:$0xff]  }
 0x169   :  { %1263 = vmatprep.subr.bf16.mxu0 %v3121_v25  ;;  %1349 = vmatprep.subr.bf16.mxu1 %v3124_v26  ;;  %v3199_v23 = vld [vmem:[#allocation8 + $0x34] ss:$12 sps:$4 sm:$0xff]   ;;  %v3197_v25 = vld [vmem:[#allocation8 + $0x30] ss:$12 sps:$4 sm:$0xff]   ;;  %v3229_v26 = vld [vmem:[#allocation8 + $0x38] ss:$12 sps:$4 sm:$0xff]  }
 0x16c   :  { %1264 = vmatpush1.bf16.msra.mxu0 %v3119_v27  ;;  %1350 = vmatpush1.bf16.msra.mxu1 %v3122_v28  ;;  %v3202_v27 = vld [vmem:[#allocation8 + $0x4c] ss:$12 sps:$4 sm:$0xff]   ;;  %v3233_v28 = vld [vmem:[#allocation8 + $0x110] ss:$12 sps:$4 sm:$0xff]  }
 0x16d   :  { %1265 = vmatprep.subr.bf16.mxu0 %v3127_v29  ;;  %1351 = vmatprep.subr.bf16.mxu1 %v3130_v30  ;;  %v3200_v29 = vld [vmem:[#allocation8 + $0x48] ss:$12 sps:$4 sm:$0xff]   ;;  %v3205_v30 = vld [vmem:[#allocation8 + $0x64] ss:$12 sps:$4 sm:$0xff]  }
 0x170   :  { %1266 = vmatpush1.bf16.msra.mxu0 %v3125_v31  ;;  %1352 = vmatpush1.bf16.msra.mxu1 %v3128_v32  ;;  %v3238_v31 = vld [vmem:[#allocation8 + $0x128] ss:$12 sps:$4 sm:$0xff]   ;;  %v3203_v32 = vld [vmem:[#allocation8 + $0x60] ss:$12 sps:$4 sm:$0xff]  }
 0x171   :  { %1267 = vmatprep.subr.bf16.mxu0 %v3133_v33  ;;  %1353 = vmatprep.subr.bf16.mxu1 %v3136_v34  ;;  %v3239_v33 = vld [vmem:[#allocation8 + $0x68] ss:$12 sps:$4 sm:$0xff]  }
 0x172   :  { %v3208_v34 = vld [vmem:[#allocation8 + $0x7c] ss:$12 sps:$4 sm:$0xff]  }
 0x174   :  { %1268 = vmatpush1.bf16.msra.mxu0 %v3131_v35  ;;  %1354 = vmatpush1.bf16.msra.mxu1 %v3134_v36  ;;  %v3243_v35 = vld [vmem:[#allocation8 + $0x140] ss:$12 sps:$4 sm:$0xff]   ;;  %v3206_v36 = vld [vmem:[#allocation8 + $0x78] ss:$12 sps:$4 sm:$0xff]  }
 0x175   :  { %1269 = vmatprep.subr.bf16.mxu0 %v3139_v39  ;;  %1355 = vmatprep.subr.bf16.mxu1 %v3142_v41  ;;  %v3244_v39 = vld [vmem:[#allocation8 + $0x80] ss:$12 sps:$4 sm:$0xff]  }
 0x176   :  { %v3211_v41 = vld [vmem:[#allocation8 + $0x94] ss:$12 sps:$4 sm:$0xff]  }
 0x178   :  { %1270 = vmatpush1.bf16.msra.mxu0 %v3137_v42  ;;  %1356 = vmatpush1.bf16.msra.mxu1 %v3140_v43  ;;  %v3209_v42 = vld [vmem:[#allocation8 + $0x90] ss:$12 sps:$4 sm:$0xff]   ;;  %v3214_v43 = vld [vmem:[#allocation8 + $0xac] ss:$12 sps:$4 sm:$0xff]  }
 0x179   :  { %1271 = vmatprep.subr.bf16.mxu0 %v3145_v44  ;;  %1357 = vmatprep.subr.bf16.mxu1 %v3148_v45  ;;  %v3212_v44 = vld [vmem:[#allocation8 + $0xa8] ss:$12 sps:$4 sm:$0xff]   ;;  %v3217_v45 = vld [vmem:[#allocation8 + $0xc4] ss:$12 sps:$4 sm:$0xff]  }
 0x17c   :  { %1272 = vmatpush1.bf16.msra.mxu0 %v3143_v46  ;;  %1358 = vmatpush1.bf16.msra.mxu1 %v3146_v47  ;;  %v3215_v46 = vld [vmem:[#allocation8 + $0xc0] ss:$12 sps:$4 sm:$0xff]   ;;  %v3222_v47 = vld [vmem:[#allocation8 + $0xdc] ss:$12 sps:$4 sm:$0xff]  }
 0x17d   :  { %1273 = vmatprep.subr.bf16.mxu0 %v3151_v48  ;;  %1359 = vmatprep.subr.bf16.mxu1 %v3154_v49  ;;  %v3220_v48 = vld [vmem:[#allocation8 + $0xd8] ss:$12 sps:$4 sm:$0xff]   ;;  %v3227_v49 = vld [vmem:[#allocation8 + $0xf4] ss:$12 sps:$4 sm:$0xff]  }
 0x180   :  { %1274 = vmatpush1.bf16.msra.mxu0 %v3149_v50  ;;  %1360 = vmatpush1.bf16.msra.mxu1 %v3152_v51  ;;  %v3225_v50 = vld [vmem:[#allocation8 + $0xf0] ss:$12 sps:$4 sm:$0xff]   ;;  %v3232_v51 = vld [vmem:[#allocation8 + $0x10c] ss:$12 sps:$4 sm:$0xff]  }
 0x181   :  { %1275 = vmatprep.subr.bf16.mxu0 %v3157_v52  ;;  %1361 = vmatprep.subr.bf16.mxu1 %v3160_v54  ;;  %v3230_v52 = vld [vmem:[#allocation8 + $0x108] ss:$12 sps:$4 sm:$0xff]   ;;  %v3237_v54 = vld [vmem:[#allocation8 + $0x124] ss:$12 sps:$4 sm:$0xff]  }
 0x184   :  { %1276 = vmatpush1.bf16.msra.mxu0 %v3155_v55  ;;  %1362 = vmatpush1.bf16.msra.mxu1 %v3158_v57  ;;  %v3235_v55 = vld [vmem:[#allocation8 + $0x120] ss:$12 sps:$4 sm:$0xff]   ;;  %v3242_v57 = vld [vmem:[#allocation8 + $0x13c] ss:$12 sps:$4 sm:$0xff]  }
 0x185   :  { %1277 = vmatprep.subr.bf16.mxu0 %v3163_v58  ;;  %1363 = vmatprep.subr.bf16.mxu1 %v3166_v59  ;;  %v3240_v58 = vld [vmem:[#allocation8 + $0x138] ss:$12 sps:$4 sm:$0xff]   ;;  %v3247_v59 = vld [vmem:[#allocation8 + $0x154] ss:$12 sps:$4 sm:$0xff]  }
 0x188   :  { %1278 = vmatpush1.bf16.msra.mxu0 %v3161_v60  ;;  %1364 = vmatpush1.bf16.msra.mxu1 %v3164_v61  ;;  %v3248_v60 = vld [vmem:[#allocation8 + $0x158] ss:$12 sps:$4 sm:$0xff]   ;;  %v3245_v61 = vld [vmem:[#allocation8 + $0x150] ss:$12 sps:$4 sm:$0xff]  }
 0x189   :  { %1279 = vmatprep.subr.bf16.mxu0 %v3169_v62  ;;  %1365 = vmatprep.subr.bf16.mxu1 %v3172_v63  ;;  %v3249_v62 = vld [vmem:[#allocation8 + $0x98] ss:$12 sps:$4 sm:$0xff]  }
 0x18a   :  { %v3252_v63 = vld [vmem:[#allocation8 + $0x16c] ss:$12 sps:$4 sm:$0xff]  }
 0x18c   :  { %1280 = vmatpush1.bf16.msra.mxu0 %v3167_v0  ;;  %1366 = vmatpush1.bf16.msra.mxu1 %v3170_v1  ;;  %v3253_v0 = vld [vmem:[#allocation8 + $0x170] ss:$12 sps:$4 sm:$0xff]   ;;  %v3250_v1 = vld [vmem:[#allocation8 + $0x168] ss:$12 sps:$4 sm:$0xff]  }
 0x18d   :  { %1281 = vmatprep.subr.bf16.mxu0 %v3175_v2  ;;  %1367 = vmatprep.subr.bf16.mxu1 %v3178_v3  ;;  %v3254_v2 = vld [vmem:[#allocation8 + $0xb0] ss:$12 sps:$4 sm:$0xff]  }
 0x18e   :  { %v3257_v3 = vld [vmem:[#allocation8 + $0x184] ss:$12 sps:$4 sm:$0xff]  }
 0x190   :  { %1282 = vmatpush1.bf16.msra.mxu0 %v3173_v4  ;;  %1368 = vmatpush1.bf16.msra.mxu1 %v3176_v5  ;;  %v3258_v4 = vld [vmem:[#allocation8 + $0x248] ss:$12 sps:$4 sm:$0xff]   ;;  %v550_v5 = vld [vmem:[%s3692_s4] sm:$0xf] }
 0x191   :  { %1283 = vmatprep.subr.bf16.mxu0 %v3181_v6  ;;  %1369 = vmatprep.subr.bf16.mxu1 %v3184_v7  ;;  %v555_v6 = vrot.slane %v550_v5, %v3625_v38  ;;  %v563_v7 = vrot.slane %v550_v5, %v3636_v53 }
 0x194   :  { %1284 = vmatpush1.bf16.msra.mxu0 %v3179_v8  ;;  %1370 = vmatpush1.bf16.msra.mxu1 %v3182_v9  ;;  %v559_v8 = vrot.slane %v550_v5, %v3631_v40  ;;  %v567_v9 = vrot.slane %v550_v5, %v152_v56  ;;  %v3290_v5 = vld [vmem:[#allocation8 + $0x228] ss:$12 sps:$4 sm:$0xff]  }
 0x195   :  { %1285 = vmatprep.subr.bf16.mxu0 %v3187_v10  ;;  %1371 = vmatprep.subr.bf16.mxu1 %v3190_v11 }
 0x198   :  { %1286 = vmatpush1.bf16.msra.mxu0 %v3185_v12  ;;  %1372 = vmatpush1.bf16.msra.mxu1 %v3188_v13 }
 0x199   :  { %2053 = vmatprep.subr.bf16.mxu0 %v3193_v14  ;;  %2814 = vmatprep.subr.bf16.mxu1 %v3218_v15 }
 0x19b   :  { %1288 = vmatmul.mubr.bf16.vlgmr.msra.gmra.mrb[4].mxu0 %v3642_v21  ;;  %1374 = vmatmul.mubr.bf16.vlgmr.msra.gmra.mrb[4].mxu1 %v3642_v21  ;;  %v3234_v21 = vld [vmem:[#allocation8 + $0x50] ss:$12 sps:$4 sm:$0xff]  }
 0x19c   :  { %2054 = vmatpush1.bf16.msra.mxu0 %v3191_v16  ;;  %2815 = vmatpush3.bf16.msra.mxu1 %v3219_v17 }
 0x19d   :  { %2055 = vmatprep.subr.bf16.mxu0 %v3196_v18  ;;  %2816 = vmatprep.subr.bf16.mxu1 %v3223_v19 }
 0x1a0   :  { %2056 = vmatpush1.bf16.msra.mxu0 %v3194_v20  ;;  %2817 = vmatpush3.bf16.msra.mxu1 %v3224_v22 }
 0x1a1   :  { %2057 = vmatprep.subr.bf16.mxu0 %v3199_v23  ;;  %2818 = vmatprep.subr.bf16.mxu1 %v3228_v24 }
 0x1a4   :  { %2058 = vmatpush1.bf16.msra.mxu0 %v3197_v25  ;;  %2819 = vmatpush3.bf16.msra.mxu1 %v3229_v26 }
 0x1a5   :  { %2059 = vmatprep.subr.bf16.mxu0 %v3202_v27  ;;  %2820 = vmatprep.subr.bf16.mxu1 %v3233_v28 }
 0x1a8   :  { %2060 = vmatpush1.bf16.msra.mxu0 %v3200_v29  ;;  %2821 = vmatpush3.bf16.msra.mxu1 %v3234_v21 }
 0x1a9   :  { %2061 = vmatprep.subr.bf16.mxu0 %v3205_v30  ;;  %2822 = vmatprep.subr.bf16.mxu1 %v3238_v31 }
 0x1ac   :  { %2062 = vmatpush1.bf16.msra.mxu0 %v3203_v32  ;;  %2823 = vmatpush3.bf16.msra.mxu1 %v3239_v33 }
 0x1ad   :  { %2063 = vmatprep.subr.bf16.mxu0 %v3208_v34  ;;  %2824 = vmatprep.subr.bf16.mxu1 %v3243_v35 }
 0x1b0   :  { %2064 = vmatpush1.bf16.msra.mxu0 %v3206_v36  ;;  %2825 = vmatpush3.bf16.msra.mxu1 %v3244_v39  ;;  %v3255_v36 = vld [vmem:[#allocation8 + $0x180] ss:$12 sps:$4 sm:$0xff]   ;;  %v3259_v39 = vld [vmem:[#allocation8 + $0x188] ss:$12 sps:$4 sm:$0xff]  }
 0x1b1   :  { %2065 = vmatprep.subr.bf16.mxu0 %v3211_v41  ;;  %2826 = vmatprep.subr.bf16.mxu1 %v3248_v60  ;;  %v3262_v41 = vld [vmem:[#allocation8 + $0x19c] ss:$12 sps:$4 sm:$0xff]   ;;  %v3283_v60 = vld [vmem:[#allocation8 + $0x2c0] ss:$12 sps:$4 sm:$0xff]  }
 0x1b4   :  { %2066 = vmatpush1.bf16.msra.mxu0 %v3209_v42  ;;  %2827 = vmatpush3.bf16.msra.mxu1 %v3249_v62  ;;  %v3263_v42 = vld [vmem:[#allocation8 + $0x260] ss:$12 sps:$4 sm:$0xff]  }
 0x1b5   :  { %2067 = vmatprep.subr.bf16.mxu0 %v3214_v43  ;;  %2828 = vmatprep.subr.bf16.mxu1 %v3253_v0  ;;  %v3260_v43 = vld [vmem:[#allocation8 + $0x198] ss:$12 sps:$4 sm:$0xff]   ;;  %v3284_v62 = vld [vmem:[#allocation8 + $0x200] ss:$12 sps:$4 sm:$0xff]  }
 0x1b6   :  { %v3288_v0 = vld [vmem:[#allocation8 + $0x2d8] ss:$12 sps:$4 sm:$0xff]  }
 0x1b8   :  { %2068 = vmatpush1.bf16.msra.mxu0 %v3212_v44  ;;  %2829 = vmatpush3.bf16.msra.mxu1 %v3254_v2  ;;  %v3264_v44 = vld [vmem:[#allocation8 + $0x1a0] ss:$12 sps:$4 sm:$0xff]   ;;  %v3289_v2 = vld [vmem:[#allocation8 + $0x218] ss:$12 sps:$4 sm:$0xff]  }
 0x1b9   :  { %2069 = vmatprep.subr.bf16.mxu0 %v3217_v45  ;;  %2836 = vmatprep.subr.bf16.mxu1 %v3258_v4  ;;  %v3267_v45 = vld [vmem:[#allocation8 + $0x1b4] ss:$12 sps:$4 sm:$0xff]   ;;  %v3293_v4 = vld [vmem:[#allocation8 + $0x2f0] ss:$12 sps:$4 sm:$0xff]  }
 0x1bc   :  { %2070 = vmatpush1.bf16.msra.mxu0 %v3215_v46  ;;  %v3268_v46 = vld [vmem:[#allocation8 + $0x278] ss:$12 sps:$4 sm:$0xff]  }
 0x1bd   :  { %2071 = vmatprep.subr.bf16.mxu0 %v3222_v47  ;;  %v3265_v47 = vld [vmem:[#allocation8 + $0x1b0] ss:$12 sps:$4 sm:$0xff]  }
 0x1c0   :  { %2072 = vmatpush1.bf16.msra.mxu0 %v3220_v48  ;;  %v3269_v48 = vld [vmem:[#allocation8 + $0x1b8] ss:$12 sps:$4 sm:$0xff]  }
 0x1c1   :  { %2073 = vmatprep.subr.bf16.mxu0 %v3227_v49  ;;  %v3272_v49 = vld [vmem:[#allocation8 + $0x1cc] ss:$12 sps:$4 sm:$0xff]  }
 0x1c4   :  { %2074 = vmatpush1.bf16.msra.mxu0 %v3225_v50  ;;  %v3273_v50 = vld [vmem:[#allocation8 + $0x290] ss:$12 sps:$4 sm:$0xff]  }
 0x1c5   :  { %2075 = vmatprep.subr.bf16.mxu0 %v3232_v51  ;;  %v3270_v51 = vld [vmem:[#allocation8 + $0x1c8] ss:$12 sps:$4 sm:$0xff]  }
 0x1c8   :  { %2076 = vmatpush1.bf16.msra.mxu0 %v3230_v52  ;;  %v3274_v52 = vld [vmem:[#allocation8 + $0x1d0] ss:$12 sps:$4 sm:$0xff]  }
 0x1c9   :  { %2077 = vmatprep.subr.bf16.mxu0 %v3237_v54  ;;  %v3277_v54 = vld [vmem:[#allocation8 + $0x1e4] ss:$12 sps:$4 sm:$0xff]  }
 0x1cc   :  { %2078 = vmatpush1.bf16.msra.mxu0 %v3235_v55  ;;  %v3278_v55 = vld [vmem:[#allocation8 + $0x2a8] ss:$12 sps:$4 sm:$0xff]  }
 0x1cd   :  { %2079 = vmatprep.subr.bf16.mxu0 %v3242_v57  ;;  %v3275_v57 = vld [vmem:[#allocation8 + $0x1e0] ss:$12 sps:$4 sm:$0xff]  }
 0x1d0   :  { %2080 = vmatpush1.bf16.msra.mxu0 %v3240_v58  ;;  %v3279_v58 = vld [vmem:[#allocation8 + $0x1e8] ss:$12 sps:$4 sm:$0xff]  }
 0x1d1   :  { %2081 = vmatprep.subr.bf16.mxu0 %v3247_v59  ;;  %v3282_v59 = vld [vmem:[#allocation8 + $0x1fc] ss:$12 sps:$4 sm:$0xff]  }
 0x1d4   :  { %2082 = vmatpush1.bf16.msra.mxu0 %v3245_v61  ;;  %v3280_v61 = vld [vmem:[#allocation8 + $0x1f8] ss:$12 sps:$4 sm:$0xff]  }
 0x1d5   :  { %2083 = vmatprep.subr.bf16.mxu0 %v3252_v63  ;;  %v3287_v63 = vld [vmem:[#allocation8 + $0x214] ss:$12 sps:$4 sm:$0xff]  }
 0x1d8   :  { %2084 = vmatpush1.bf16.msra.mxu0 %v3250_v1  ;;  %v3285_v1 = vld [vmem:[#allocation8 + $0x210] ss:$12 sps:$4 sm:$0xff]  }
 0x1d9   :  { %2096 = vmatprep.subr.bf16.mxu0 %v3257_v3  ;;  %v3292_v3 = vld [vmem:[#allocation8 + $0x22c] ss:$12 sps:$4 sm:$0xff]  }
 0x26e   :  { %v1289_v10 = vpop.f32.mrb[4].mxu0  ;;  %v1375_v11 = vpop.f32.mrb[4].mxu1 }
 0x26f   :  { %v2909_v12 = vadd.f32 %v1289_v10, %v555_v6  ;;  %v2913_v13 = vadd.f32 %v1375_v11, %v563_v7  ;;  %v1291_v14 = vpop.f32.mrb[5].mxu0  ;;  %v1377_v15 = vpop.f32.mrb[5].mxu1  ;;  %v3298_v10 = vld [vmem:[#allocation8 + $0x258] ss:$12 sps:$4 sm:$0xff]   ;;  %v3303_v11 = vld [vmem:[#allocation8 + $0x274] ss:$12 sps:$4 sm:$0xff]  }
 0x270   :  { %v2910_v16 = vadd.f32 %v1291_v14, %v559_v8  ;;  %v2914_v17 = vadd.f32 %v1377_v15, %v567_v9  ;;  %v1293_v18 = vpop.f32.mrb[6].mxu0  ;;  %v1379_v19 = vpop.f32.mrb[6].mxu1  ;;  %v3304_v14 = vld [vmem:[#allocation8 + $0x288] ss:$12 sps:$4 sm:$0xff]   ;;  %v3309_v15 = vld [vmem:[#allocation8 + $0x2a4] ss:$12 sps:$4 sm:$0xff]  }
 0x271   :  { %v2911_v20 = vadd.f32 %v1293_v18, %v555_v6  ;;  %v2915_v22 = vadd.f32 %v1379_v19, %v563_v7  ;;  %v1295_v23 = vpop.f32.mrb[7].mxu0  ;;  %v1381_v24 = vpop.f32.mrb[7].mxu1  ;;  %v1384_v27 = vmax.f32 %v2909_v12, 0.0  ;;  %v1386_v28 = vmax.f32 %v2913_v13, 0.0  ;;  %v3294_v6 = vld [vmem:[#allocation8 + $0x230] ss:$12 sps:$4 sm:$0xff]  }
 0x272   :  { %v2912_v25 = vadd.f32 %v1295_v23, %v559_v8  ;;  %v2916_v26 = vadd.f32 %v1381_v24, %v567_v9  ;;  %v1385_v29 = vmax.f32 %v2910_v16, 0.0  ;;  %v1387_v21 = vmax.f32 %v2914_v17, 0.0  ;;  %v3297_v7 = vld [vmem:[#allocation8 + $0x244] ss:$12 sps:$4 sm:$0xff]   ;;  %v3295_v8 = vld [vmem:[#allocation8 + $0x240] ss:$12 sps:$4 sm:$0xff]  }
 0x273   :  { %v1388_v37 = vmax.f32 %v2911_v20, 0.0  ;;  %v1390_v56 = vmax.f32 %v2915_v22, 0.0  ;;  %v3300_v9 = vld [vmem:[#allocation8 + $0x25c] ss:$12 sps:$4 sm:$0xff]   ;;  %v3306_v13 = vld [vmem:[#allocation8 + $0x28c] ss:$12 sps:$4 sm:$0xff]  }
 0x274   :  { %v1389_v30 = vmax.f32 %v2912_v25, 0.0  ;;  %v1391_v31 = vmax.f32 %v2916_v26, 0.0  ;;  %v3301_v12 = vld [vmem:[#allocation8 + $0x270] ss:$12 sps:$4 sm:$0xff]   ;;  %v3307_v16 = vld [vmem:[#allocation8 + $0x2a0] ss:$12 sps:$4 sm:$0xff]  }
 0x275   :  { %v1392_v32 = vpack.c.bf16 %v1388_v37, %v1384_v27  ;;  %v3654_v33 = vpack.c.bf16 %v1390_v56, %v1386_v28  ;;  %v3312_v17 = vld [vmem:[#allocation8 + $0x2bc] ss:$12 sps:$4 sm:$0xff]   ;;  %v3310_v18 = vld [vmem:[#allocation8 + $0x2b8] ss:$12 sps:$4 sm:$0xff]   ;;  %v3315_v19 = vld [vmem:[#allocation8 + $0x2d4] ss:$12 sps:$4 sm:$0xff]  }
 0x276   :  { %v1393_v34 = vpack.c.bf16 %v1389_v30, %v1385_v29  ;;  %v1395_v35 = vpack.c.bf16 %v1391_v31, %v1387_v21  ;;  %v3313_v20 = vld [vmem:[#allocation8 + $0x2d0] ss:$12 sps:$4 sm:$0xff]   ;;  %v3318_v22 = vld [vmem:[#allocation8 + $0x2ec] ss:$12 sps:$4 sm:$0xff]   ;;  %v3316_v23 = vld [vmem:[#allocation8 + $0x2e8] ss:$12 sps:$4 sm:$0xff]  }
 0x277   :  { %v3319_v24 = vld [vmem:[#allocation10 + $0x40] sm:$0xff]   ;;  %v3321_v26 = vld [vmem:[#allocation10 + $0x48] sm:$0xff]   ;;  %v3323_v28 = vld [vmem:[#allocation10 + $0x50] sm:$0xff]  }
 0x278   :  { %2085 = vmatprep.mubr.bf16.mxu0 %v1393_v34  ;;  %2171 = vmatprep.mubr.bf16.mxu1 %v1393_v34  ;;  %v3320_v25 = vld [vmem:[#allocation10] sm:$0xff]   ;;  %v3322_v27 = vld [vmem:[#allocation10 + $0x8] sm:$0xff]   ;;  %v3324_v37 = vld [vmem:[#allocation10 + $0x10] sm:$0xff]  }
 0x279   :  { %2086 = vmatmul.mubr.bf16.vlgmr.msra.gmra.mrb[8].mxu0 %v1392_v32  ;;  %2172 = vmatmul.mubr.bf16.vlgmr.msra.gmra.mrb[8].mxu1 %v1392_v32  ;;  %v3325_v56 = vld [vmem:[#allocation10 + $0x58] sm:$0xff]   ;;  %v3327_v21 = vld [vmem:[#allocation10 + $0x60] sm:$0xff]   ;;  %v3329_v31 = vld [vmem:[#allocation10 + $0x68] sm:$0xff]  }
 0x27a   :  { %2097 = vmatpush1.bf16.msra.mxu0 %v3255_v36  ;;  %2837 = vmatpush3.bf16.msra.mxu1 %v3259_v39  ;;  %v3326_v29 = vld [vmem:[#allocation10 + $0x18] sm:$0xff]   ;;  %v3328_v30 = vld [vmem:[#allocation10 + $0x20] sm:$0xff]   ;;  %v3330_v32 = vld [vmem:[#allocation10 + $0x28] sm:$0xff]   ;;  %v3495_v39 = vmov 0.0  }
 0x27b   :  { %2128 = vmatprep.mubr.bf16.mxu0 %v1395_v35  ;;  %2212 = vmatprep.mubr.bf16.mxu1 %v1395_v35  ;;  %v3332_v34 = vld [vmem:[#allocation10 + $0x30] sm:$0xff]   ;;  %v3333_v35 = vld [vmem:[#allocation10 + $0x78] sm:$0xff]  }
 0x27c   :  { %2098 = vmatprep.subr.bf16.mxu0 %v3262_v41  ;;  %2838 = vmatprep.subr.bf16.mxu1 %v3263_v42  ;;  %v3334_v36 = vld [vmem:[#allocation10 + $0x38] sm:$0xff]  }
 0x27e   :  { %2099 = vmatpush1.bf16.msra.mxu0 %v3260_v43  ;;  %2839 = vmatpush3.bf16.msra.mxu1 %v3264_v44 }
 0x27f   :  { %2100 = vmatprep.subr.bf16.mxu0 %v3267_v45  ;;  %2840 = vmatprep.subr.bf16.mxu1 %v3268_v46 }
 0x282   :  { %2101 = vmatpush1.bf16.msra.mxu0 %v3265_v47  ;;  %2841 = vmatpush3.bf16.msra.mxu1 %v3269_v48  ;;  %v1524_v47 = vld [vmem:[%s3694_s6] sm:$0x7] }
 0x283   :  { %2102 = vmatprep.subr.bf16.mxu0 %v3272_v49  ;;  %2842 = vmatprep.subr.bf16.mxu1 %v3273_v50  ;;  %v1537_v48 = vrot.slane %v1524_v47, %v3636_v53 }
 0x286   :  { %2103 = vmatpush1.bf16.msra.mxu0 %v3270_v51  ;;  %2843 = vmatpush3.bf16.msra.mxu1 %v3274_v52 }
 0x287   :  { %2104 = vmatprep.subr.bf16.mxu0 %v3277_v54  ;;  %2844 = vmatprep.subr.bf16.mxu1 %v3278_v55 }
 0x28a   :  { %2105 = vmatpush1.bf16.msra.mxu0 %v3275_v57  ;;  %2845 = vmatpush3.bf16.msra.mxu1 %v3279_v58 }
 0x28b   :  { %2106 = vmatprep.subr.bf16.mxu0 %v3282_v59  ;;  %2846 = vmatprep.subr.bf16.mxu1 %v3283_v60 }
 0x28e   :  { %2107 = vmatpush1.bf16.msra.mxu0 %v3280_v61  ;;  %2847 = vmatpush3.bf16.msra.mxu1 %v3284_v62 }
 0x28f   :  { %2108 = vmatprep.subr.bf16.mxu0 %v3287_v63  ;;  %2848 = vmatprep.subr.bf16.mxu1 %v3288_v0  ;;  %v1529_v0 = vrot.slane %v1524_v47, %v3625_v38  ;;  %v3336_v38 = vld [vmem:[#allocation10 + $0x88] sm:$0xff]  }
 0x292   :  { %2109 = vmatpush1.bf16.msra.mxu0 %v3285_v1  ;;  %2849 = vmatpush3.bf16.msra.mxu1 %v3289_v2  ;;  %v1533_v1 = vrot.slane %v1524_v47, %v3631_v40  ;;  %v3337_v40 = vld [vmem:[#allocation10 + $0x90] sm:$0xff]  }
 0x293   :  { %2110 = vmatprep.subr.bf16.mxu0 %v3292_v3  ;;  %2850 = vmatprep.subr.bf16.mxu1 %v3293_v4 }
 0x296   :  { %2111 = vmatpush1.bf16.msra.mxu0 %v3290_v5  ;;  %2851 = vmatpush3.bf16.msra.mxu1 %v3294_v6 }
 0x297   :  { %2112 = vmatprep.subr.bf16.mxu0 %v3297_v7  ;;  %2858 = vmatprep.subr.bf16.mxu1 %v3319_v24 }
 0x299   :  { %2213 = vmatmul.mubr.bf16.vlgmr.msra.gmra.mrb[12].mxu1 %v3654_v33 }
 0x29a   :  { %2113 = vmatpush1.bf16.msra.mxu0 %v3295_v8  ;;  %2859 = vmatpush3.bf16.msra.mxu1 %v3320_v25 }
 0x29b   :  { %2114 = vmatprep.subr.bf16.mxu0 %v3300_v9  ;;  %2860 = vmatprep.subr.bf16.mxu1 %v3321_v26 }
 0x29e   :  { %2115 = vmatpush1.bf16.msra.mxu0 %v3298_v10  ;;  %2861 = vmatpush3.bf16.msra.mxu1 %v3322_v27 }
 0x29f   :  { %2116 = vmatprep.subr.bf16.mxu0 %v3303_v11  ;;  %2862 = vmatprep.subr.bf16.mxu1 %v3323_v28  ;;  %v2789_v28 = vld [vmem:[%s3696_s8] ss:$0 sm:$0xff] }
 0x2a2   :  { %2117 = vmatpush1.bf16.msra.mxu0 %v3301_v12  ;;  %2863 = vmatpush3.bf16.msra.mxu1 %v3324_v37 }
 0x2a3   :  { %2118 = vmatprep.subr.bf16.mxu0 %v3306_v13  ;;  %2864 = vmatprep.subr.bf16.mxu1 %v3325_v56 }
 0x2a6   :  { %2119 = vmatpush1.bf16.msra.mxu0 %v3304_v14  ;;  %2865 = vmatpush3.bf16.msra.mxu1 %v3326_v29 }
 0x2a7   :  { %2120 = vmatprep.subr.bf16.mxu0 %v3309_v15  ;;  %2866 = vmatprep.subr.bf16.mxu1 %v3327_v21  ;;  %v3335_v15 = vld [vmem:[#allocation10 + $0x80] sm:$0xff]  }
 0x2aa   :  { %2121 = vmatpush1.bf16.msra.mxu0 %v3307_v16  ;;  %2867 = vmatpush3.bf16.msra.mxu1 %v3328_v30  ;;  %v3338_v16 = vld [vmem:[#allocation10 + $0x98] sm:$0xff]  }
 0x2ab   :  { %2122 = vmatprep.subr.bf16.mxu0 %v3312_v17  ;;  %2868 = vmatprep.subr.bf16.mxu1 %v3329_v31  ;;  %v3339_v17 = vld [vmem:[#allocation10 + $0xa0] sm:$0xff]  }
 0x2ae   :  { %2123 = vmatpush1.bf16.msra.mxu0 %v3310_v18  ;;  %2869 = vmatpush3.bf16.msra.mxu1 %v3330_v32  ;;  %v3340_v18 = vld [vmem:[#allocation10 + $0xa8] sm:$0xff]  }
 0x2af   :  { %2124 = vmatprep.subr.bf16.mxu0 %v3315_v19  ;;  %v3341_v19 = vld [vmem:[#allocation10 + $0xb0] sm:$0xff]  }
 0x2b2   :  { %2125 = vmatpush1.bf16.msra.mxu0 %v3313_v20  ;;  %v3342_v20 = vld [vmem:[#allocation10 + $0xb8] sm:$0xff]  }
 0x2b3   :  { %2126 = vmatprep.subr.bf16.mxu0 %v3318_v22 }
 0x2b6   :  { %2127 = vmatpush1.bf16.msra.mxu0 %v3316_v23 }
 0x2b9   :  { %2129 = vmatmul.mubr.bf16.vlgmr.msra.gmra.mrb[8].mxu0 %v3654_v33  ;;  %v3331_v33 = vld [vmem:[#allocation10 + $0x70] sm:$0xff]  }
 0x2ba   :  { %2870 = vmatprep.subr.bf16.mxu1 %v3331_v33 }
 0x2bb   :  { %2871 = vmatpush3.bf16.msra.mxu1 %v3332_v34 }
 0x2bc   :  { %2872 = vmatprep.subr.bf16.mxu1 %v3333_v35 }
 0x2bf   :  { %2873 = vmatpush3.bf16.msra.mxu1 %v3334_v36 }
 0x2c0   :  { %2889 = vmatprep.subr.bf16.mxu1 %v3495_v39 }
 0x34c   :  { %v2830_v41 = vpop.f32.mrb[8].mxu1 }
 0x34d   :  { %v2831_v42 = vpop.f32.mrb[9].mxu1 }
 0x34e   :  { %v2832_v43 = vadd.f32 %v2831_v42, %v2830_v41  ;;  %v2833_v44 = vpop.f32.mrb[10].mxu1 }
 0x34f   :  { %v2834_v45 = vpop.f32.mrb[11].mxu1 }
 0x350   :  { %v2835_v46 = vadd.f32 %v2834_v45, %v2833_v44  ;;  %v2174_v51 = vadd.f32 %v2832_v43, %v1537_v48 }
 0x352   :  { %v2177_v57 = vadd.f32 %v2835_v46, %v1537_v48 }
 0x36c   :  { %v2852_v49 = vpop.f32.mrb[12].mxu1 }
 0x36d   :  { %v2853_v50 = vpop.f32.mrb[13].mxu1 }
 0x36e   :  { %v2854_v52 = vadd.f32 %v2853_v50, %v2852_v49  ;;  %v2855_v54 = vpop.f32.mrb[14].mxu1 }
 0x36f   :  { %v2856_v55 = vpop.f32.mrb[15].mxu1 }
 0x370   :  { %v2215_v58 = vadd.f32 %v2854_v52, %v2174_v51  ;;  %v2857_v59 = vadd.f32 %v2856_v55, %v2855_v54 }
 0x372   :  { %v2218_v60 = vadd.f32 %v2857_v59, %v2177_v57  ;;  %v2223_v61 = vmax.f32 %v2215_v58, 0.0 }
 0x374   :  { %v2226_v62 = vmax.f32 %v2218_v60, 0.0 }
 0x376   :  { %v2229_v63 = vpack.c.bf16 %v2226_v62, %v2223_v61 }
 0x38c   :  { %v2130_v2 = vpop.f32.mrb[8].mxu0 }
 0x38d   :  { %v2917_v3 = vadd.f32 %v2130_v2, %v1529_v0  ;;  %v2132_v53 = vpop.f32.mrb[9].mxu0 }
 0x38e   :  { %v2918_v4 = vadd.f32 %v2132_v53, %v1533_v1  ;;  %v2134_v5 = vpop.f32.mrb[10].mxu0 }
 0x38f   :  { %v2919_v6 = vadd.f32 %v2134_v5, %v1529_v0  ;;  %v2136_v7 = vpop.f32.mrb[11].mxu0  ;;  %v2221_v9 = vmax.f32 %v2917_v3, 0.0 }
 0x390   :  { %v2920_v8 = vadd.f32 %v2136_v7, %v1533_v1  ;;  %v2222_v11 = vmax.f32 %v2918_v4, 0.0 }
 0x391   :  { %v2224_v10 = vmax.f32 %v2919_v6, 0.0 }
 0x392   :  { %v2225_v12 = vmax.f32 %v2920_v8, 0.0 }
 0x393   :  { %v2227_v13 = vpack.c.bf16 %v2224_v10, %v2221_v9 }
 0x394   :  { %v2228_v14 = vpack.c.bf16 %v2225_v12, %v2222_v11 }
 0x396   :  { %2461 = vmatprep.mubr.bf16.mxu1 %v2228_v14 }
 0x397   :  { %2462 = vmatmul.mubr.bf16.vlgmr.msra.gmra.mrb[16].mxu1 %v2227_v13 }
 0x398   :  { %2890 = vmatpush3.bf16.msra.mxu1 %v3335_v15  ;;  %2905 = vmatprep.mubr.msk.bf16.mxu1 %vm3496_vm0, %v3495_v39 }
 0x399   :  { %2891 = vmatprep.subr.bf16.mxu1 %v3495_v39 }
 0x39c   :  { %2892 = vmatpush3.bf16.msra.mxu1 %v3336_v38 }
 0x39d   :  { %2893 = vmatprep.subr.bf16.mxu1 %v3495_v39 }
 0x3a0   :  { %2894 = vmatpush3.bf16.msra.mxu1 %v3337_v40 }
 0x3a1   :  { %2895 = vmatprep.subr.bf16.mxu1 %v3495_v39 }
 0x3a4   :  { %2896 = vmatpush3.bf16.msra.mxu1 %v3338_v16 }
 0x3a5   :  { %2897 = vmatprep.subr.bf16.mxu1 %v3495_v39 }
 0x3a8   :  { %2898 = vmatpush3.bf16.msra.mxu1 %v3339_v17 }
 0x3a9   :  { %2899 = vmatprep.subr.bf16.mxu1 %v3495_v39 }
 0x3ac   :  { %2900 = vmatpush3.bf16.msra.mxu1 %v3340_v18 }
 0x3ad   :  { %2901 = vmatprep.subr.bf16.mxu1 %v3495_v39 }
 0x3b0   :  { %2902 = vmatpush3.bf16.msra.mxu1 %v3341_v19 }
 0x3b1   :  { %2903 = vmatprep.subr.bf16.mxu1 %v3495_v39 }
 0x3b4   :  { %2904 = vmatpush3.bf16.msra.mxu1 %v3342_v20 }
 0x3b7   :  { %2906 = vmatmul.mubr.bf16.vlgmr.msra.gmra.mrb[20].mxu1 %v2229_v63 }
 0x46a   :  { %v2874_v22 = vpop.f32.mrb[16].mxu1 }
 0x46b   :  { %v2875_v23 = vpop.f32.mrb[17].mxu1 }
 0x46c   :  { %v2876_v24 = vadd.f32 %v2875_v23, %v2874_v22  ;;  %v2877_v25 = vpop.f32.mrb[18].mxu1 }
 0x46d   :  { %v2878_v26 = vpop.f32.mrb[19].mxu1 }
 0x46e   :  { %v2879_v27 = vadd.f32 %v2878_v26, %v2877_v25  ;;  %v2464_v37 = vadd.f32 %v2876_v24, %v2789_v28 }
 0x470   :  { %v2467_v30 = vadd.f32 %v2879_v27, %v2789_v28 }
 0x48a   :  { %v2504_v56 = vpop.f32.mrb[20].mxu1 }
 0x48b   :  { %v2505_v29 = vadd.f32 %v2504_v56, %v2464_v37  ;;  %v2907_v21 = vpop.f32.mrb[21].mxu1 }
 0x48c   :  { %v2507_v31 = vpop.f32.mrb[22].mxu1 }
 0x48d   :  { %2511 = vst [vmem:[#allocation11] sm:$0xff] %v2505_v29  ;;  %v2508_v32 = vadd.f32 %v2507_v31, %v2467_v30  ;;  %v2908_v33 = vpop.f32.mrb[23].mxu1 }
 0x48f   :  { %2512 = vst [vmem:[#allocation11 + $0x8] sm:$0xff] %v2508_v32 }
 0x490   :  { %3464 = shalt.err (!%p3461_p2)
}
 0x491   :  { %s3465_s15 = scalar_lea.hbm %s3697_s9, 256 }
 0x492   :  { %p3466_p3 = scmp.ne.s32.totalorder %s3697_s9, %s3465_s15  ;;  %p3469_p4 = scmp.lt.u32.totalorder %s3465_s15, %s3697_s9 }
 0x494   :  { %p3471_p5 = pnand %p3469_p4, %p3466_p3 }
 0x496   :  { %3474 = shalt.err (!%p3471_p5)
}
 0x497   :  { %s3498_s16 = smov 128   ;;  %s3499_s22 = smov 8  }
 0x498   :  { %2524 = dma.vmem_to_hbm [thread:$0]  %s2519_s10, 256, %s3697_s9, [#allocation4], %s3498_s16, %s3498_s16, %s3499_s22  }
 0x499   :  { %3481 = dma.done.wait [#allocation4], 256  }
 0x49a   :  { %3482 = vsyncadd [#allocation4], 4294967040 }
 0x49b   :  { %2528 = vsyncpa [#allocation3], 1 }
 0x49c   :  { %2529 = vsyncpa [#allocation6], 1 }
 0x49d   :  { %2530 = vsyncpa [#allocation9], 1 }
 0x49e   :  { %2531 = vsyncpa [#allocation4], 1 }

</bundles_post_ra>
